<compile_context>
chip_gen: v7x
topology: tpu7x:2x2x1
jax: 0.10.0
libtpu: 0.0.40
codegen_flags: <defaults>
</compile_context>

<pallas_src>
import jax
import jax.numpy as jnp
from jax.experimental import pallas as pl
from jax.experimental.pallas import tpu as pltpu


# --------------------------------------------------------------------------
# Kernel
# --------------------------------------------------------------------------
def _block_kernel(x_ref, wqkv_ref, wp_ref, relb_ref,
                  w1_ref, b1_ref, w2_ref, b2_ref, o_ref, cat_ref):
    # x_ref:    (Bt, N, C)   f32
    # wqkv_ref: (C, 3C)      bf16   (fused [Wq | Wk | Wv])
    # wp_ref:   (C, C)       bf16   (output projection, full-K matmul)
    # relb_ref: (H, N, N)    bf16   (relative positional bias)
    # w1_ref:   (C, hidden)  bf16 ; b1_ref: (1, hidden) f32
    # w2_ref:   (hidden, C)  bf16 ; b2_ref: (1, C)      f32
    # cat_ref:  (Bt, N, C)   bf16 VMEM scratch (per-head ctx concat buffer)
    bt, N, C = x_ref.shape
    H = relb_ref.shape[0]
    dh = C // H
    scale = float(dh) ** -0.5
    M = bt * N                                            # matmul M dimension

    x = x_ref[...].reshape(M, C)                          # (M, C) f32
    x_bf = x.astype(jnp.bfloat16)

    # ---- fused QKV projection (one MXU pass), single bf16 cast of result ----
    qkv = jnp.dot(x_bf, wqkv_ref[...],
                  preferred_element_type=jnp.float32).astype(jnp.bfloat16)

    # ---- multi-head attention with relative positional bias ----
    # Each head's context is written into its column range of cat_ref; the
    # output projection runs once after the loop with full contraction K = C.
    for h in range(H):                                    # H static -> unrolled
        q = qkv[:, h * dh:(h + 1) * dh].reshape(bt, N, dh)
        k = qkv[:, C + h * dh:C + (h + 1) * dh].reshape(bt, N, dh)
        v = qkv[:, 2 * C + h * dh:2 * C + (h + 1) * dh].reshape(bt, N, dh)

        logits = jnp.einsum('bnd,bmd->bnm', q, k,
                            preferred_element_type=jnp.float32) * scale
        logits = logits + relb_ref[h].astype(jnp.float32)     # (N,N) bcast over batch

        # numerically-stable softmax over the key axis (f32)
        logits = logits - jnp.max(logits, axis=-1, keepdims=True)
        e = jnp.exp(logits)
        p = e * pl.reciprocal(jnp.sum(e, axis=-1, keepdims=True), approx=True)

        ctx = jnp.einsum('bnm,bmd->bnd', p.astype(jnp.bfloat16), v,
                         preferred_element_type=jnp.float32)   # (bt, N, dh)
        cat_ref[:, :, h * dh:(h + 1) * dh] = ctx.astype(jnp.bfloat16)

    attn = jnp.dot(cat_ref[...].reshape(M, C), wp_ref[...],
                   preferred_element_type=jnp.float32)         # (M, C), K = C

    # gating #1
    x1 = x * (1.0 - attn)

    # ---- MLP: fc1 -> GELU(tanh) -> fc2 ----
    hdn = jnp.dot(x1.astype(jnp.bfloat16), w1_ref[...],
                  preferred_element_type=jnp.float32) + b1_ref[...]
    hdn = jax.nn.gelu(hdn, approximate=True)
    m = jnp.dot(hdn.astype(jnp.bfloat16), w2_ref[...],
                preferred_element_type=jnp.float32) + b2_ref[...]

    # gating #2
    o_ref[...] = (x1 * (1.0 - m)).reshape(bt, N, C)


# --------------------------------------------------------------------------
# Wrapper
# --------------------------------------------------------------------------
def _vmem_capacity_bytes():
    try:
        return int(pltpu.get_tpu_info().vmem_capacity_bytes)
    except Exception:
        return 128 * 1024 * 1024          # v5e/v6e default


def _pick_batch_tile(B, N, step_bytes, budget):
    divs = [d for d in range(1, B + 1) if B % d == 0]
    fits = [d for d in divs if step_bytes(d) <= budget] or [1]
    multi_step = [d for d in fits if (B // d) >= 2]
    # Prefer: >= 2 grid steps (DMA/compute overlap, both v7x cores) and
    # M = bt*N >= 512 rows (amortize MXU push/pop), smallest such tile.
    pref = [d for d in multi_step if d * N >= 512 and (d * N) % 8 == 0]
    if pref:
        return min(pref)
    if multi_step:
        return max(multi_step)            # biggest tile that keeps >= 2 steps
    return max(fits)


def prepare_params(params):
    """One-time weight preparation — call once, reuse across forward calls."""
    return {
        "wqkv": jnp.concatenate([params["wq"], params["wk"], params["wv"]],
                                axis=1).astype(jnp.bfloat16),        # (C, 3C)
        "wproj": params["wproj"].astype(jnp.bfloat16),               # (C, C)
        "rel_bias": params["rel_bias"].astype(jnp.bfloat16),         # (H, N, N)
        "w1": params["w1"].astype(jnp.bfloat16),
        "b1": params["b1"].astype(jnp.float32),
        "w2": params["w2"].astype(jnp.bfloat16),
        "b2": params["b2"].astype(jnp.float32),
        "num_heads": int(params["rel_bias"].shape[0]),
    }


def block_forward(x, prep, *, batch_tile=None):
    B, N, C = x.shape
    H = prep["num_heads"]
    hidden = prep["w1"].shape[1]

    # Generation-aware VMEM limit: ~3/4 of physical per-core VMEM, capped at 96 MiB.
    cap = _vmem_capacity_bytes()
    vmem_limit = max(32 * 1024 * 1024, min(3 * cap // 4, 96 * 1024 * 1024))

    # Resident weight bytes (assuming single-buffered invariant specs).
    w_bytes = ((prep["wqkv"].size + prep["wproj"].size + prep["rel_bias"].size
                + prep["w1"].size + prep["w2"].size) * 2
               + (prep["b1"].size + prep["b2"].size) * 4)

    def step_bytes(bt):
        M = bt * N
        io = 2 * 2 * M * C * 4                      # x + out tiles, double-buffered f32
        qkv = M * 3 * C * 2                         # bf16
        cat = M * C * 2                             # bf16 scratch
        att = 2 * bt * N * N * 4                    # one head's f32 logits + exp
        mlp = M * hidden * 4 + M * C * 4            # fc1 activations + x1
        return io + qkv + cat + att + mlp

    budget = vmem_limit - w_bytes - (4 << 20)       # headroom for compiler scratch
    if batch_tile is None:
        batch_tile = _pick_batch_tile(B, N, step_bytes, budget)
    bt = batch_tile
    assert B % bt == 0

    def make_call(single_buffer_weights):
        wmode = ({"pipeline_mode": pl.Buffered(1)}
                 if single_buffer_weights else {})

        def rep(*shape):
            return pl.BlockSpec(shape, lambda b: (0,) * len(shape), **wmode)

        return pl.pallas_call(
            _block_kernel,
            out_shape=jax.ShapeDtypeStruct((B, N, C), jnp.float32),
            grid_spec=pltpu.PrefetchScalarGridSpec(
                num_scalar_prefetch=0,
                grid=(B // bt,),
                in_specs=[
                    pl.BlockSpec((bt, N, C), lambda b: (b, 0, 0)),   # x tile
                    rep(C, 3 * C),                                   # fused Wqkv
                    rep(C, C),                                       # Wproj
                    rep(H, N, N),                                    # rel bias
                    rep(C, hidden),                                  # W1
                    rep(1, hidden),                                  # b1
                    rep(hidden, C),                                  # W2
                    rep(1, C),                                       # b2
                ],
                out_specs=pl.BlockSpec((bt, N, C), lambda b: (b, 0, 0)),
                scratch_shapes=[pltpu.VMEM((bt, N, C), jnp.bfloat16)],
            ),
            compiler_params=pltpu.CompilerParams(
                dimension_semantics=("parallel",),
                vmem_limit_bytes=int(vmem_limit),
            ),
        )

    args = (x.astype(jnp.float32), prep["wqkv"], prep["wproj"], prep["rel_bias"],
            prep["w1"], prep["b1"], prep["w2"], prep["b2"])
    try:
        return make_call(True)(*args)
    except Exception:
        # TODO(synk): pl.Buffered(1) single-buffering not supported by this JAX
        # version; fall back to default double-buffered invariant weights.
        return make_call(False)(*args)


# --------------------------------------------------------------------------
# Params / reference
# --------------------------------------------------------------------------
def init_params(key, dim, seq_len, num_heads, mlp_ratio=2.0):
    hidden = int(dim * mlp_ratio)
    ks = jax.random.split(key, 8)
    std = 0.02
    return {
        "wq": jax.random.normal(ks[0], (dim, dim), jnp.float32) * std,
        "wk": jax.random.normal(ks[1], (dim, dim), jnp.float32) * std,
        "wv": jax.random.normal(ks[2], (dim, dim), jnp.float32) * std,
        "wproj": jax.random.normal(ks[3], (dim, dim), jnp.float32) * std,
        "rel_bias": jax.random.normal(ks[4], (num_heads, seq_len, seq_len),
                                      jnp.float32) * std,
        "w1": jax.random.normal(ks[5], (dim, hidden), jnp.float32) * std,
        "b1": jnp.zeros((1, hidden), jnp.float32),
        "w2": jax.random.normal(ks[6], (hidden, dim), jnp.float32) * std,
        "b2": jnp.zeros((1, dim), jnp.float32),
    }


def block_reference(x, params):
    """Pure-JAX f32 reference of the same forward (for sanity checking)."""
    B, N, C = x.shape
    H = params["rel_bias"].shape[0]
    dh = C // H
    scale = dh ** -0.5

    def heads(t):
        return t.reshape(B, N, H, dh).transpose(0, 2, 1, 3)

    q = heads(x @ params["wq"])
    k = heads(x @ params["wk"])
    v = heads(x @ params["wv"])
    logits = jnp.einsum('bhnd,bhmd->bhnm', q, k) * scale + params["rel_bias"][None]
    p = jax.nn.softmax(logits, axis=-1)
    ctx = jnp.einsum('bhnm,bhmd->bhnd', p, v).transpose(0, 2, 1, 3).reshape(B, N, C)
    attn = ctx @ params["wproj"]
    x1 = x * (1.0 - attn)
    h = jax.nn.gelu(x1 @ params["w1"] + params["b1"], approximate=True)
    m = h @ params["w2"] + params["b2"]
    return x1 * (1.0 - m)


# --------------------------------------------------------------------------
if __name__ == "__main__":
    B, N, C, H = 2, 8, 32, 4   # batch, seq_len, dim, num_heads ; mlp_ratio=2 -> hidden=64
    key = jax.random.PRNGKey(0)
    kx, kp = jax.random.split(key)
    x = jax.random.normal(kx, (B, N, C), jnp.float32)
    params = init_params(kp, dim=C, seq_len=N, num_heads=H, mlp_ratio=2.0)

    prep = prepare_params(params)          # one-time weight prep (hoisted out of forward)
    out = block_forward(x, prep)
    jax.block_until_ready(out)

    assert out.shape == (B, N, C) and out.dtype == jnp.float32
    assert bool(jnp.all(jnp.isfinite(out)))

    ref = block_reference(x, params)       # loose tolerance: bf16 matmuls + approx recip
    assert bool(jnp.allclose(out, ref, atol=5e-2, rtol=5e-2)), \
        float(jnp.max(jnp.abs(out - ref)))
    print("KERNEL_OK")
</pallas_src>

<mosaic_0001>
module attributes {stable_mosaic.version = 11 : i64} {
  func.func @_block_kernel(%arg0: i32, %arg1: memref<1x8x32xf32, #tpu.memory_space<vmem>>, %arg2: memref<32x96xbf16, #tpu.memory_space<vmem>>, %arg3: memref<32x32xbf16, #tpu.memory_space<vmem>>, %arg4: memref<4x8x8xbf16, #tpu.memory_space<vmem>>, %arg5: memref<32x64xbf16, #tpu.memory_space<vmem>>, %arg6: memref<1x64xf32, #tpu.memory_space<vmem>>, %arg7: memref<64x32xbf16, #tpu.memory_space<vmem>>, %arg8: memref<1x32xf32, #tpu.memory_space<vmem>>, %arg9: memref<1x8x32xf32, #tpu.memory_space<vmem>>, %arg10: memref<1x8x32xbf16, #tpu.memory_space<vmem>>) attributes {dimension_semantics = [#tpu.dimension_semantics<parallel>], iteration_bounds = array<i64: 2>, scalar_prefetch = 0 : i64, scratch_operands = 1 : i64, tpu.core_type = #tpu.core_type<tc>, window_params = [{transform_indices = @transform_0, window_bounds = array<i64: 1, 8, 32>}, {pipeline_mode = #tpu.pipeline_mode<synchronous>, transform_indices = @transform_1, window_bounds = array<i64: 32, 96>}, {pipeline_mode = #tpu.pipeline_mode<synchronous>, transform_indices = @transform_2, window_bounds = array<i64: 32, 32>}, {pipeline_mode = #tpu.pipeline_mode<synchronous>, transform_indices = @transform_3, window_bounds = array<i64: 4, 8, 8>}, {pipeline_mode = #tpu.pipeline_mode<synchronous>, transform_indices = @transform_4, window_bounds = array<i64: 32, 64>}, {pipeline_mode = #tpu.pipeline_mode<synchronous>, transform_indices = @transform_5, window_bounds = array<i64: 1, 64>}, {pipeline_mode = #tpu.pipeline_mode<synchronous>, transform_indices = @transform_6, window_bounds = array<i64: 64, 32>}, {pipeline_mode = #tpu.pipeline_mode<synchronous>, transform_indices = @transform_7, window_bounds = array<i64: 1, 32>}, {transform_indices = @transform_8, window_bounds = array<i64: 1, 8, 32>}]} {
    %c0 = arith.constant 0 : index
    %c0_0 = arith.constant 0 : index
    %c0_1 = arith.constant 0 : index
    %0 = vector.load %arg1[%c0, %c0_0, %c0_1] : memref<1x8x32xf32, #tpu.memory_space<vmem>>, vector<1x8x32xf32>
    %1 = vector.shape_cast %0 : vector<1x8x32xf32> to vector<8x32xf32>
    %2 = arith.truncf %1 : vector<8x32xf32> to vector<8x32xbf16>
    %c0_2 = arith.constant 0 : index
    %c0_3 = arith.constant 0 : index
    %3 = vector.load %arg2[%c0_2, %c0_3] : memref<32x96xbf16, #tpu.memory_space<vmem>>, vector<32x96xbf16>
    %cst = arith.constant dense<0.000000e+00> : vector<8x96xf32>
    %4 = tpu.matmul %2, %3, %cst {dimension_numbers = #tpu.dot_dimension_numbers<[1], [0], [0], [1], [0, 0, 1, 1], [], []>} : vector<8x32xbf16>, vector<32x96xbf16>, vector<8x96xf32> -> vector<8x96xf32>
    %5 = arith.truncf %4 : vector<8x96xf32> to vector<8x96xbf16>
    %6 = vector.extract_strided_slice %5 {offsets = [0, 0], sizes = [8, 8], strides = [1, 1]} : vector<8x96xbf16> to vector<8x8xbf16>
    %7 = vector.shape_cast %6 : vector<8x8xbf16> to vector<1x8x8xbf16>
    %8 = vector.extract_strided_slice %5 {offsets = [0, 32], sizes = [8, 8], strides = [1, 1]} : vector<8x96xbf16> to vector<8x8xbf16>
    %9 = vector.shape_cast %8 : vector<8x8xbf16> to vector<1x8x8xbf16>
    %10 = vector.extract_strided_slice %5 {offsets = [0, 64], sizes = [8, 8], strides = [1, 1]} : vector<8x96xbf16> to vector<8x8xbf16>
    %11 = vector.shape_cast %10 : vector<8x8xbf16> to vector<1x8x8xbf16>
    "tpu.trace_start"() <{level = 10 : i32, message = "bnd,bmd->bnm"}> : () -> ()
    %cst_4 = arith.constant dense<0.000000e+00> : vector<1x8x8xf32>
    %12 = tpu.matmul %7, %9, %cst_4 {dimension_numbers = #tpu.dot_dimension_numbers<[2], [2], [1], [1], [0, 0, 0, 1, 1, 1], [0], [0]>} : vector<1x8x8xbf16>, vector<1x8x8xbf16>, vector<1x8x8xf32> -> vector<1x8x8xf32>
    "tpu.trace_stop"() : () -> ()
    %cst_5 = arith.constant 0.353553385 : f32
    %13 = vector.broadcast %cst_5 : f32 to vector<1x8x8xf32>
    %14 = arith.mulf %12, %13 : vector<1x8x8xf32>
    %c0_6 = arith.constant 0 : index
    %c0_7 = arith.constant 0 : index
    %c0_8 = arith.constant 0 : index
    %15 = vector.load %arg4[%c0_6, %c0_7, %c0_8] : memref<4x8x8xbf16, #tpu.memory_space<vmem>>, vector<1x8x8xbf16>
    %16 = vector.shape_cast %15 : vector<1x8x8xbf16> to vector<8x8xbf16>
    %17 = arith.extf %16 : vector<8x8xbf16> to vector<8x8xf32>
    %18 = vector.shape_cast %17 : vector<8x8xf32> to vector<1x8x8xf32>
    %19 = arith.addf %14, %18 : vector<1x8x8xf32>
    %cst_9 = arith.constant dense<0xFF800000> : vector<1x8xf32>
    %20 = vector.multi_reduction <maximumf>, %19, %cst_9 [2] : vector<1x8x8xf32> to vector<1x8xf32>
    %21 = vector.shape_cast %20 : vector<1x8xf32> to vector<1x8x1xf32>
    %22 = vector.broadcast %21 : vector<1x8x1xf32> to vector<1x8x8xf32>
    %23 = arith.subf %19, %22 : vector<1x8x8xf32>
    %24 = math.exp %23 : vector<1x8x8xf32>
    %cst_10 = arith.constant dense<0.000000e+00> : vector<1x8xf32>
    %25 = vector.multi_reduction <add>, %24, %cst_10 [2] : vector<1x8x8xf32> to vector<1x8xf32>
    %26 = vector.shape_cast %25 : vector<1x8xf32> to vector<1x8x1xf32>
    %27 = tpu.reciprocal %26 {approx = true} : vector<1x8x1xf32> -> vector<1x8x1xf32>
    %28 = vector.broadcast %27 : vector<1x8x1xf32> to vector<1x8x8xf32>
    %29 = arith.mulf %24, %28 : vector<1x8x8xf32>
    %30 = arith.truncf %29 : vector<1x8x8xf32> to vector<1x8x8xbf16>
    "tpu.trace_start"() <{level = 10 : i32, message = "bnm,bmd->bnd"}> : () -> ()
    %cst_11 = arith.constant dense<0.000000e+00> : vector<1x8x8xf32>
    %31 = tpu.matmul %30, %11, %cst_11 {dimension_numbers = #tpu.dot_dimension_numbers<[2], [1], [1], [2], [0, 0, 0, 1, 1, 2], [0], [0]>} : vector<1x8x8xbf16>, vector<1x8x8xbf16>, vector<1x8x8xf32> -> vector<1x8x8xf32>
    "tpu.trace_stop"() : () -> ()
    %32 = arith.truncf %31 : vector<1x8x8xf32> to vector<1x8x8xbf16>
    %c0_12 = arith.constant 0 : index
    %c0_13 = arith.constant 0 : index
    %c0_14 = arith.constant 0 : index
    %33 = vector.load %arg10[%c0_12, %c0_13, %c0_14] : memref<1x8x32xbf16, #tpu.memory_space<vmem>>, vector<1x8x8xbf16>
    tpu.vector_store %arg10[%c0_12, %c0_13, %c0_14], %32 {strides = array<i32>} : memref<1x8x32xbf16, #tpu.memory_space<vmem>>, vector<1x8x8xbf16>,
    %34 = vector.extract_strided_slice %5 {offsets = [0, 8], sizes = [8, 8], strides = [1, 1]} : vector<8x96xbf16> to vector<8x8xbf16>
    %35 = vector.shape_cast %34 : vector<8x8xbf16> to vector<1x8x8xbf16>
    %36 = vector.extract_strided_slice %5 {offsets = [0, 40], sizes = [8, 8], strides = [1, 1]} : vector<8x96xbf16> to vector<8x8xbf16>
    %37 = vector.shape_cast %36 : vector<8x8xbf16> to vector<1x8x8xbf16>
    %38 = vector.extract_strided_slice %5 {offsets = [0, 72], sizes = [8, 8], strides = [1, 1]} : vector<8x96xbf16> to vector<8x8xbf16>
    %39 = vector.shape_cast %38 : vector<8x8xbf16> to vector<1x8x8xbf16>
    "tpu.trace_start"() <{level = 10 : i32, message = "bnd,bmd->bnm"}> : () -> ()
    %cst_15 = arith.constant dense<0.000000e+00> : vector<1x8x8xf32>
    %40 = tpu.matmul %35, %37, %cst_15 {dimension_numbers = #tpu.dot_dimension_numbers<[2], [2], [1], [1], [0, 0, 0, 1, 1, 1], [0], [0]>} : vector<1x8x8xbf16>, vector<1x8x8xbf16>, vector<1x8x8xf32> -> vector<1x8x8xf32>
    "tpu.trace_stop"() : () -> ()
    %cst_16 = arith.constant 0.353553385 : f32
    %41 = vector.broadcast %cst_16 : f32 to vector<1x8x8xf32>
    %42 = arith.mulf %40, %41 : vector<1x8x8xf32>
    %c1 = arith.constant 1 : index
    %c0_17 = arith.constant 0 : index
    %c0_18 = arith.constant 0 : index
    %43 = vector.load %arg4[%c1, %c0_17, %c0_18] : memref<4x8x8xbf16, #tpu.memory_space<vmem>>, vector<1x8x8xbf16>
    %44 = vector.shape_cast %43 : vector<1x8x8xbf16> to vector<8x8xbf16>
    %45 = arith.extf %44 : vector<8x8xbf16> to vector<8x8xf32>
    %46 = vector.shape_cast %45 : vector<8x8xf32> to vector<1x8x8xf32>
    %47 = arith.addf %42, %46 : vector<1x8x8xf32>
    %cst_19 = arith.constant dense<0xFF800000> : vector<1x8xf32>
    %48 = vector.multi_reduction <maximumf>, %47, %cst_19 [2] : vector<1x8x8xf32> to vector<1x8xf32>
    %49 = vector.shape_cast %48 : vector<1x8xf32> to vector<1x8x1xf32>
    %50 = vector.broadcast %49 : vector<1x8x1xf32> to vector<1x8x8xf32>
    %51 = arith.subf %47, %50 : vector<1x8x8xf32>
    %52 = math.exp %51 : vector<1x8x8xf32>
    %cst_20 = arith.constant dense<0.000000e+00> : vector<1x8xf32>
    %53 = vector.multi_reduction <add>, %52, %cst_20 [2] : vector<1x8x8xf32> to vector<1x8xf32>
    %54 = vector.shape_cast %53 : vector<1x8xf32> to vector<1x8x1xf32>
    %55 = tpu.reciprocal %54 {approx = true} : vector<1x8x1xf32> -> vector<1x8x1xf32>
    %56 = vector.broadcast %55 : vector<1x8x1xf32> to vector<1x8x8xf32>
    %57 = arith.mulf %52, %56 : vector<1x8x8xf32>
    %58 = arith.truncf %57 : vector<1x8x8xf32> to vector<1x8x8xbf16>
    "tpu.trace_start"() <{level = 10 : i32, message = "bnm,bmd->bnd"}> : () -> ()
    %cst_21 = arith.constant dense<0.000000e+00> : vector<1x8x8xf32>
    %59 = tpu.matmul %58, %39, %cst_21 {dimension_numbers = #tpu.dot_dimension_numbers<[2], [1], [1], [2], [0, 0, 0, 1, 1, 2], [0], [0]>} : vector<1x8x8xbf16>, vector<1x8x8xbf16>, vector<1x8x8xf32> -> vector<1x8x8xf32>
    "tpu.trace_stop"() : () -> ()
    %60 = arith.truncf %59 : vector<1x8x8xf32> to vector<1x8x8xbf16>
    %c0_22 = arith.constant 0 : index
    %c0_23 = arith.constant 0 : index
    %c8 = arith.constant 8 : index
    %61 = vector.load %arg10[%c0_22, %c0_23, %c8] : memref<1x8x32xbf16, #tpu.memory_space<vmem>>, vector<1x8x8xbf16>
    tpu.vector_store %arg10[%c0_22, %c0_23, %c8], %60 {strides = array<i32>} : memref<1x8x32xbf16, #tpu.memory_space<vmem>>, vector<1x8x8xbf16>,
    %62 = vector.extract_strided_slice %5 {offsets = [0, 16], sizes = [8, 8], strides = [1, 1]} : vector<8x96xbf16> to vector<8x8xbf16>
    %63 = vector.shape_cast %62 : vector<8x8xbf16> to vector<1x8x8xbf16>
    %64 = vector.extract_strided_slice %5 {offsets = [0, 48], sizes = [8, 8], strides = [1, 1]} : vector<8x96xbf16> to vector<8x8xbf16>
    %65 = vector.shape_cast %64 : vector<8x8xbf16> to vector<1x8x8xbf16>
    %66 = vector.extract_strided_slice %5 {offsets = [0, 80], sizes = [8, 8], strides = [1, 1]} : vector<8x96xbf16> to vector<8x8xbf16>
    %67 = vector.shape_cast %66 : vector<8x8xbf16> to vector<1x8x8xbf16>
    "tpu.trace_start"() <{level = 10 : i32, message = "bnd,bmd->bnm"}> : () -> ()
    %cst_24 = arith.constant dense<0.000000e+00> : vector<1x8x8xf32>
    %68 = tpu.matmul %63, %65, %cst_24 {dimension_numbers = #tpu.dot_dimension_numbers<[2], [2], [1], [1], [0, 0, 0, 1, 1, 1], [0], [0]>} : vector<1x8x8xbf16>, vector<1x8x8xbf16>, vector<1x8x8xf32> -> vector<1x8x8xf32>
    "tpu.trace_stop"() : () -> ()
    %cst_25 = arith.constant 0.353553385 : f32
    %69 = vector.broadcast %cst_25 : f32 to vector<1x8x8xf32>
    %70 = arith.mulf %68, %69 : vector<1x8x8xf32>
    %c2 = arith.constant 2 : index
    %c0_26 = arith.constant 0 : index
    %c0_27 = arith.constant 0 : index
    %71 = vector.load %arg4[%c2, %c0_26, %c0_27] : memref<4x8x8xbf16, #tpu.memory_space<vmem>>, vector<1x8x8xbf16>
    %72 = vector.shape_cast %71 : vector<1x8x8xbf16> to vector<8x8xbf16>
    %73 = arith.extf %72 : vector<8x8xbf16> to vector<8x8xf32>
    %74 = vector.shape_cast %73 : vector<8x8xf32> to vector<1x8x8xf32>
    %75 = arith.addf %70, %74 : vector<1x8x8xf32>
    %cst_28 = arith.constant dense<0xFF800000> : vector<1x8xf32>
    %76 = vector.multi_reduction <maximumf>, %75, %cst_28 [2] : vector<1x8x8xf32> to vector<1x8xf32>
    %77 = vector.shape_cast %76 : vector<1x8xf32> to vector<1x8x1xf32>
    %78 = vector.broadcast %77 : vector<1x8x1xf32> to vector<1x8x8xf32>
    %79 = arith.subf %75, %78 : vector<1x8x8xf32>
    %80 = math.exp %79 : vector<1x8x8xf32>
    %cst_29 = arith.constant dense<0.000000e+00> : vector<1x8xf32>
    %81 = vector.multi_reduction <add>, %80, %cst_29 [2] : vector<1x8x8xf32> to vector<1x8xf32>
    %82 = vector.shape_cast %81 : vector<1x8xf32> to vector<1x8x1xf32>
    %83 = tpu.reciprocal %82 {approx = true} : vector<1x8x1xf32> -> vector<1x8x1xf32>
    %84 = vector.broadcast %83 : vector<1x8x1xf32> to vector<1x8x8xf32>
    %85 = arith.mulf %80, %84 : vector<1x8x8xf32>
    %86 = arith.truncf %85 : vector<1x8x8xf32> to vector<1x8x8xbf16>
    "tpu.trace_start"() <{level = 10 : i32, message = "bnm,bmd->bnd"}> : () -> ()
    %cst_30 = arith.constant dense<0.000000e+00> : vector<1x8x8xf32>
    %87 = tpu.matmul %86, %67, %cst_30 {dimension_numbers = #tpu.dot_dimension_numbers<[2], [1], [1], [2], [0, 0, 0, 1, 1, 2], [0], [0]>} : vector<1x8x8xbf16>, vector<1x8x8xbf16>, vector<1x8x8xf32> -> vector<1x8x8xf32>
    "tpu.trace_stop"() : () -> ()
    %88 = arith.truncf %87 : vector<1x8x8xf32> to vector<1x8x8xbf16>
    %c0_31 = arith.constant 0 : index
    %c0_32 = arith.constant 0 : index
    %c16 = arith.constant 16 : index
    %89 = vector.load %arg10[%c0_31, %c0_32, %c16] : memref<1x8x32xbf16, #tpu.memory_space<vmem>>, vector<1x8x8xbf16>
    tpu.vector_store %arg10[%c0_31, %c0_32, %c16], %88 {strides = array<i32>} : memref<1x8x32xbf16, #tpu.memory_space<vmem>>, vector<1x8x8xbf16>,
    %90 = vector.extract_strided_slice %5 {offsets = [0, 24], sizes = [8, 8], strides = [1, 1]} : vector<8x96xbf16> to vector<8x8xbf16>
    %91 = vector.shape_cast %90 : vector<8x8xbf16> to vector<1x8x8xbf16>
    %92 = vector.extract_strided_slice %5 {offsets = [0, 56], sizes = [8, 8], strides = [1, 1]} : vector<8x96xbf16> to vector<8x8xbf16>
    %93 = vector.shape_cast %92 : vector<8x8xbf16> to vector<1x8x8xbf16>
    %94 = vector.extract_strided_slice %5 {offsets = [0, 88], sizes = [8, 8], strides = [1, 1]} : vector<8x96xbf16> to vector<8x8xbf16>
    %95 = vector.shape_cast %94 : vector<8x8xbf16> to vector<1x8x8xbf16>
    "tpu.trace_start"() <{level = 10 : i32, message = "bnd,bmd->bnm"}> : () -> ()
    %cst_33 = arith.constant dense<0.000000e+00> : vector<1x8x8xf32>
    %96 = tpu.matmul %91, %93, %cst_33 {dimension_numbers = #tpu.dot_dimension_numbers<[2], [2], [1], [1], [0, 0, 0, 1, 1, 1], [0], [0]>} : vector<1x8x8xbf16>, vector<1x8x8xbf16>, vector<1x8x8xf32> -> vector<1x8x8xf32>
    "tpu.trace_stop"() : () -> ()
    %cst_34 = arith.constant 0.353553385 : f32
    %97 = vector.broadcast %cst_34 : f32 to vector<1x8x8xf32>
    %98 = arith.mulf %96, %97 : vector<1x8x8xf32>
    %c3 = arith.constant 3 : index
    %c0_35 = arith.constant 0 : index
    %c0_36 = arith.constant 0 : index
    %99 = vector.load %arg4[%c3, %c0_35, %c0_36] : memref<4x8x8xbf16, #tpu.memory_space<vmem>>, vector<1x8x8xbf16>
    %100 = vector.shape_cast %99 : vector<1x8x8xbf16> to vector<8x8xbf16>
    %101 = arith.extf %100 : vector<8x8xbf16> to vector<8x8xf32>
    %102 = vector.shape_cast %101 : vector<8x8xf32> to vector<1x8x8xf32>
    %103 = arith.addf %98, %102 : vector<1x8x8xf32>
    %cst_37 = arith.constant dense<0xFF800000> : vector<1x8xf32>
    %104 = vector.multi_reduction <maximumf>, %103, %cst_37 [2] : vector<1x8x8xf32> to vector<1x8xf32>
    %105 = vector.shape_cast %104 : vector<1x8xf32> to vector<1x8x1xf32>
    %106 = vector.broadcast %105 : vector<1x8x1xf32> to vector<1x8x8xf32>
    %107 = arith.subf %103, %106 : vector<1x8x8xf32>
    %108 = math.exp %107 : vector<1x8x8xf32>
    %cst_38 = arith.constant dense<0.000000e+00> : vector<1x8xf32>
    %109 = vector.multi_reduction <add>, %108, %cst_38 [2] : vector<1x8x8xf32> to vector<1x8xf32>
    %110 = vector.shape_cast %109 : vector<1x8xf32> to vector<1x8x1xf32>
    %111 = tpu.reciprocal %110 {approx = true} : vector<1x8x1xf32> -> vector<1x8x1xf32>
    %112 = vector.broadcast %111 : vector<1x8x1xf32> to vector<1x8x8xf32>
    %113 = arith.mulf %108, %112 : vector<1x8x8xf32>
    %114 = arith.truncf %113 : vector<1x8x8xf32> to vector<1x8x8xbf16>
    "tpu.trace_start"() <{level = 10 : i32, message = "bnm,bmd->bnd"}> : () -> ()
    %cst_39 = arith.constant dense<0.000000e+00> : vector<1x8x8xf32>
    %115 = tpu.matmul %114, %95, %cst_39 {dimension_numbers = #tpu.dot_dimension_numbers<[2], [1], [1], [2], [0, 0, 0, 1, 1, 2], [0], [0]>} : vector<1x8x8xbf16>, vector<1x8x8xbf16>, vector<1x8x8xf32> -> vector<1x8x8xf32>
    "tpu.trace_stop"() : () -> ()
    %116 = arith.truncf %115 : vector<1x8x8xf32> to vector<1x8x8xbf16>
    %c0_40 = arith.constant 0 : index
    %c0_41 = arith.constant 0 : index
    %c24 = arith.constant 24 : index
    %117 = vector.load %arg10[%c0_40, %c0_41, %c24] : memref<1x8x32xbf16, #tpu.memory_space<vmem>>, vector<1x8x8xbf16>
    tpu.vector_store %arg10[%c0_40, %c0_41, %c24], %116 {strides = array<i32>} : memref<1x8x32xbf16, #tpu.memory_space<vmem>>, vector<1x8x8xbf16>,
    %c0_42 = arith.constant 0 : index
    %c0_43 = arith.constant 0 : index
    %c0_44 = arith.constant 0 : index
    %118 = vector.load %arg10[%c0_42, %c0_43, %c0_44] : memref<1x8x32xbf16, #tpu.memory_space<vmem>>, vector<1x8x32xbf16>
    %119 = vector.shape_cast %118 : vector<1x8x32xbf16> to vector<8x32xbf16>
    %c0_45 = arith.constant 0 : index
    %c0_46 = arith.constant 0 : index
    %120 = vector.load %arg3[%c0_45, %c0_46] : memref<32x32xbf16, #tpu.memory_space<vmem>>, vector<32x32xbf16>
    %cst_47 = arith.constant dense<0.000000e+00> : vector<8x32xf32>
    %121 = tpu.matmul %119, %120, %cst_47 {dimension_numbers = #tpu.dot_dimension_numbers<[1], [0], [0], [1], [0, 0, 1, 1], [], []>} : vector<8x32xbf16>, vector<32x32xbf16>, vector<8x32xf32> -> vector<8x32xf32>
    %cst_48 = arith.constant 1.000000e+00 : f32
    %122 = vector.broadcast %cst_48 : f32 to vector<8x32xf32>
    %123 = arith.subf %122, %121 : vector<8x32xf32>
    %124 = arith.mulf %1, %123 : vector<8x32xf32>
    %125 = arith.truncf %124 : vector<8x32xf32> to vector<8x32xbf16>
    %c0_49 = arith.constant 0 : index
    %c0_50 = arith.constant 0 : index
    %126 = vector.load %arg5[%c0_49, %c0_50] : memref<32x64xbf16, #tpu.memory_space<vmem>>, vector<32x64xbf16>
    %cst_51 = arith.constant dense<0.000000e+00> : vector<8x64xf32>
    %127 = tpu.matmul %125, %126, %cst_51 {dimension_numbers = #tpu.dot_dimension_numbers<[1], [0], [0], [1], [0, 0, 1, 1], [], []>} : vector<8x32xbf16>, vector<32x64xbf16>, vector<8x64xf32> -> vector<8x64xf32>
    %c0_52 = arith.constant 0 : index
    %c0_53 = arith.constant 0 : index
    %128 = vector.load %arg6[%c0_52, %c0_53] : memref<1x64xf32, #tpu.memory_space<vmem>>, vector<1x64xf32>
    %129 = vector.broadcast %128 : vector<1x64xf32> to vector<8x64xf32>
    %130 = arith.addf %127, %129 : vector<8x64xf32>
    %131 = arith.mulf %130, %130 : vector<8x64xf32>
    %132 = arith.mulf %130, %131 : vector<8x64xf32>
    %cst_54 = arith.constant 4.471500e-02 : f32
    %133 = vector.broadcast %cst_54 : f32 to vector<8x64xf32>
    %134 = arith.mulf %133, %132 : vector<8x64xf32>
    %135 = arith.addf %130, %134 : vector<8x64xf32>
    %cst_55 = arith.constant 0.797884583 : f32
    %136 = vector.broadcast %cst_55 : f32 to vector<8x64xf32>
    %137 = arith.mulf %136, %135 : vector<8x64xf32>
    %138 = math.tanh %137 : vector<8x64xf32>
    %cst_56 = arith.constant 1.000000e+00 : f32
    %139 = vector.broadcast %cst_56 : f32 to vector<8x64xf32>
    %140 = arith.addf %139, %138 : vector<8x64xf32>
    %cst_57 = arith.constant 5.000000e-01 : f32
    %141 = vector.broadcast %cst_57 : f32 to vector<8x64xf32>
    %142 = arith.mulf %141, %140 : vector<8x64xf32>
    %143 = arith.mulf %130, %142 : vector<8x64xf32>
    %144 = arith.truncf %143 : vector<8x64xf32> to vector<8x64xbf16>
    %c0_58 = arith.constant 0 : index
    %c0_59 = arith.constant 0 : index
    %145 = vector.load %arg7[%c0_58, %c0_59] : memref<64x32xbf16, #tpu.memory_space<vmem>>, vector<64x32xbf16>
    %cst_60 = arith.constant dense<0.000000e+00> : vector<8x32xf32>
    %146 = tpu.matmul %144, %145, %cst_60 {dimension_numbers = #tpu.dot_dimension_numbers<[1], [0], [0], [1], [0, 0, 1, 1], [], []>} : vector<8x64xbf16>, vector<64x32xbf16>, vector<8x32xf32> -> vector<8x32xf32>
    %c0_61 = arith.constant 0 : index
    %c0_62 = arith.constant 0 : index
    %147 = vector.load %arg8[%c0_61, %c0_62] : memref<1x32xf32, #tpu.memory_space<vmem>>, vector<1x32xf32>
    %148 = vector.broadcast %147 : vector<1x32xf32> to vector<8x32xf32>
    %149 = arith.addf %146, %148 : vector<8x32xf32>
    %cst_63 = arith.constant 1.000000e+00 : f32
    %150 = vector.broadcast %cst_63 : f32 to vector<8x32xf32>
    %151 = arith.subf %150, %149 : vector<8x32xf32>
    %152 = arith.mulf %124, %151 : vector<8x32xf32>
    %153 = vector.shape_cast %152 : vector<8x32xf32> to vector<1x8x32xf32>
    %c0_64 = arith.constant 0 : index
    %c0_65 = arith.constant 0 : index
    %c0_66 = arith.constant 0 : index
    %154 = vector.load %arg9[%c0_64, %c0_65, %c0_66] : memref<1x8x32xf32, #tpu.memory_space<vmem>>, vector<1x8x32xf32>
    tpu.vector_store %arg9[%c0_64, %c0_65, %c0_66], %153 {strides = array<i32>} : memref<1x8x32xf32, #tpu.memory_space<vmem>>, vector<1x8x32xf32>,
    return
  }
  func.func @transform_0(%arg0: i32) -> (i32, i32, i32) {
    %c0_i32 = arith.constant 0 : i32
    %c0_i32_0 = arith.constant 0 : i32
    %c0_i32_1 = arith.constant 0 : i32
    return %arg0, %c0_i32, %c0_i32_0 : i32, i32, i32
  }
  func.func @transform_1(%arg0: i32) -> (i32, i32) {
    %c0_i32 = arith.constant 0 : i32
    %c0_i32_0 = arith.constant 0 : i32
    %c0_i32_1 = arith.constant 0 : i32
    return %c0_i32, %c0_i32_0 : i32, i32
  }
  func.func @transform_2(%arg0: i32) -> (i32, i32) {
    %c0_i32 = arith.constant 0 : i32
    %c0_i32_0 = arith.constant 0 : i32
    %c0_i32_1 = arith.constant 0 : i32
    return %c0_i32, %c0_i32_0 : i32, i32
  }
  func.func @transform_3(%arg0: i32) -> (i32, i32, i32) {
    %c0_i32 = arith.constant 0 : i32
    %c0_i32_0 = arith.constant 0 : i32
    %c0_i32_1 = arith.constant 0 : i32
    %c0_i32_2 = arith.constant 0 : i32
    return %c0_i32, %c0_i32_0, %c0_i32_1 : i32, i32, i32
  }
  func.func @transform_4(%arg0: i32) -> (i32, i32) {
    %c0_i32 = arith.constant 0 : i32
    %c0_i32_0 = arith.constant 0 : i32
    %c0_i32_1 = arith.constant 0 : i32
    return %c0_i32, %c0_i32_0 : i32, i32
  }
  func.func @transform_5(%arg0: i32) -> (i32, i32) {
    %c0_i32 = arith.constant 0 : i32
    %c0_i32_0 = arith.constant 0 : i32
    %c0_i32_1 = arith.constant 0 : i32
    return %c0_i32, %c0_i32_0 : i32, i32
  }
  func.func @transform_6(%arg0: i32) -> (i32, i32) {
    %c0_i32 = arith.constant 0 : i32
    %c0_i32_0 = arith.constant 0 : i32
    %c0_i32_1 = arith.constant 0 : i32
    return %c0_i32, %c0_i32_0 : i32, i32
  }
  func.func @transform_7(%arg0: i32) -> (i32, i32) {
    %c0_i32 = arith.constant 0 : i32
    %c0_i32_0 = arith.constant 0 : i32
    %c0_i32_1 = arith.constant 0 : i32
    return %c0_i32, %c0_i32_0 : i32, i32
  }
  func.func @transform_8(%arg0: i32) -> (i32, i32, i32) {
    %c0_i32 = arith.constant 0 : i32
    %c0_i32_0 = arith.constant 0 : i32
    %c0_i32_1 = arith.constant 0 : i32
    return %arg0, %c0_i32, %c0_i32_0 : i32, i32, i32
  }
}

module attributes {stable_mosaic.version = 11 : i64} {
  func.func @_block_kernel(%arg0: i32, %arg1: memref<1x8x32xf32, #tpu.memory_space<vmem>>, %arg2: memref<32x96xbf16, #tpu.memory_space<vmem>>, %arg3: memref<32x32xbf16, #tpu.memory_space<vmem>>, %arg4: memref<4x8x8xbf16, #tpu.memory_space<vmem>>, %arg5: memref<32x64xbf16, #tpu.memory_space<vmem>>, %arg6: memref<1x64xf32, #tpu.memory_space<vmem>>, %arg7: memref<64x32xbf16, #tpu.memory_space<vmem>>, %arg8: memref<1x32xf32, #tpu.memory_space<vmem>>, %arg9: memref<1x8x32xf32, #tpu.memory_space<vmem>>, %arg10: memref<1x8x32xbf16, #tpu.memory_space<vmem>>) attributes {dimension_semantics = [#tpu.dimension_semantics<parallel>], iteration_bounds = array<i64: 2>, scalar_prefetch = 0 : i64, scratch_operands = 1 : i64, tpu.core_type = #tpu.core_type<tc>, window_params = [{transform_indices = @transform_0, window_bounds = array<i64: 1, 8, 32>}, {pipeline_mode = #tpu.pipeline_mode<synchronous>, transform_indices = @transform_1, window_bounds = array<i64: 32, 96>}, {pipeline_mode = #tpu.pipeline_mode<synchronous>, transform_indices = @transform_2, window_bounds = array<i64: 32, 32>}, {pipeline_mode = #tpu.pipeline_mode<synchronous>, transform_indices = @transform_3, window_bounds = array<i64: 4, 8, 8>}, {pipeline_mode = #tpu.pipeline_mode<synchronous>, transform_indices = @transform_4, window_bounds = array<i64: 32, 64>}, {pipeline_mode = #tpu.pipeline_mode<synchronous>, transform_indices = @transform_5, window_bounds = array<i64: 1, 64>}, {pipeline_mode = #tpu.pipeline_mode<synchronous>, transform_indices = @transform_6, window_bounds = array<i64: 64, 32>}, {pipeline_mode = #tpu.pipeline_mode<synchronous>, transform_indices = @transform_7, window_bounds = array<i64: 1, 32>}, {transform_indices = @transform_8, window_bounds = array<i64: 1, 8, 32>}]} {
    %c0 = arith.constant 0 : index
    %c0_0 = arith.constant 0 : index
    %c0_1 = arith.constant 0 : index
    %0 = vector.load %arg1[%c0, %c0_0, %c0_1] : memref<1x8x32xf32, #tpu.memory_space<vmem>>, vector<1x8x32xf32>
    %1 = vector.shape_cast %0 : vector<1x8x32xf32> to vector<8x32xf32>
    %2 = arith.truncf %1 : vector<8x32xf32> to vector<8x32xbf16>
    %c0_2 = arith.constant 0 : index
    %c0_3 = arith.constant 0 : index
    %3 = vector.load %arg2[%c0_2, %c0_3] : memref<32x96xbf16, #tpu.memory_space<vmem>>, vector<32x96xbf16>
    %cst = arith.constant dense<0.000000e+00> : vector<8x96xf32>
    %4 = tpu.matmul %2, %3, %cst {dimension_numbers = #tpu.dot_dimension_numbers<[1], [0], [0], [1], [0, 0, 1, 1], [], []>} : vector<8x32xbf16>, vector<32x96xbf16>, vector<8x96xf32> -> vector<8x96xf32>
    %5 = arith.truncf %4 : vector<8x96xf32> to vector<8x96xbf16>
    %6 = vector.extract_strided_slice %5 {offsets = [0, 0], sizes = [8, 8], strides = [1, 1]} : vector<8x96xbf16> to vector<8x8xbf16>
    %7 = vector.shape_cast %6 : vector<8x8xbf16> to vector<1x8x8xbf16>
    %8 = vector.extract_strided_slice %5 {offsets = [0, 32], sizes = [8, 8], strides = [1, 1]} : vector<8x96xbf16> to vector<8x8xbf16>
    %9 = vector.shape_cast %8 : vector<8x8xbf16> to vector<1x8x8xbf16>
    %10 = vector.extract_strided_slice %5 {offsets = [0, 64], sizes = [8, 8], strides = [1, 1]} : vector<8x96xbf16> to vector<8x8xbf16>
    %11 = vector.shape_cast %10 : vector<8x8xbf16> to vector<1x8x8xbf16>
    "tpu.trace_start"() <{level = 10 : i32, message = "bnd,bmd->bnm"}> : () -> ()
    %cst_4 = arith.constant dense<0.000000e+00> : vector<1x8x8xf32>
    %12 = tpu.matmul %7, %9, %cst_4 {dimension_numbers = #tpu.dot_dimension_numbers<[2], [2], [1], [1], [0, 0, 0, 1, 1, 1], [0], [0]>} : vector<1x8x8xbf16>, vector<1x8x8xbf16>, vector<1x8x8xf32> -> vector<1x8x8xf32>
    "tpu.trace_stop"() : () -> ()
    %cst_5 = arith.constant 0.353553385 : f32
    %13 = vector.broadcast %cst_5 : f32 to vector<1x8x8xf32>
    %14 = arith.mulf %12, %13 : vector<1x8x8xf32>
    %c0_6 = arith.constant 0 : index
    %c0_7 = arith.constant 0 : index
    %c0_8 = arith.constant 0 : index
    %15 = vector.load %arg4[%c0_6, %c0_7, %c0_8] : memref<4x8x8xbf16, #tpu.memory_space<vmem>>, vector<1x8x8xbf16>
    %16 = vector.shape_cast %15 : vector<1x8x8xbf16> to vector<8x8xbf16>
    %17 = arith.extf %16 : vector<8x8xbf16> to vector<8x8xf32>
    %18 = vector.shape_cast %17 : vector<8x8xf32> to vector<1x8x8xf32>
    %19 = arith.addf %14, %18 : vector<1x8x8xf32>
    %cst_9 = arith.constant dense<0xFF800000> : vector<1x8xf32>
    %20 = vector.multi_reduction <maximumf>, %19, %cst_9 [2] : vector<1x8x8xf32> to vector<1x8xf32>
    %21 = vector.shape_cast %20 : vector<1x8xf32> to vector<1x8x1xf32>
    %22 = vector.broadcast %21 : vector<1x8x1xf32> to vector<1x8x8xf32>
    %23 = arith.subf %19, %22 : vector<1x8x8xf32>
    %24 = math.exp %23 : vector<1x8x8xf32>
    %cst_10 = arith.constant dense<0.000000e+00> : vector<1x8xf32>
    %25 = vector.multi_reduction <add>, %24, %cst_10 [2] : vector<1x8x8xf32> to vector<1x8xf32>
    %26 = vector.shape_cast %25 : vector<1x8xf32> to vector<1x8x1xf32>
    %27 = tpu.reciprocal %26 {approx = true} : vector<1x8x1xf32> -> vector<1x8x1xf32>
    %28 = vector.broadcast %27 : vector<1x8x1xf32> to vector<1x8x8xf32>
    %29 = arith.mulf %24, %28 : vector<1x8x8xf32>
    %30 = arith.truncf %29 : vector<1x8x8xf32> to vector<1x8x8xbf16>
    "tpu.trace_start"() <{level = 10 : i32, message = "bnm,bmd->bnd"}> : () -> ()
    %cst_11 = arith.constant dense<0.000000e+00> : vector<1x8x8xf32>
    %31 = tpu.matmul %30, %11, %cst_11 {dimension_numbers = #tpu.dot_dimension_numbers<[2], [1], [1], [2], [0, 0, 0, 1, 1, 2], [0], [0]>} : vector<1x8x8xbf16>, vector<1x8x8xbf16>, vector<1x8x8xf32> -> vector<1x8x8xf32>
    "tpu.trace_stop"() : () -> ()
    %32 = arith.truncf %31 : vector<1x8x8xf32> to vector<1x8x8xbf16>
    %c0_12 = arith.constant 0 : index
    %c0_13 = arith.constant 0 : index
    %c0_14 = arith.constant 0 : index
    %33 = vector.load %arg10[%c0_12, %c0_13, %c0_14] : memref<1x8x32xbf16, #tpu.memory_space<vmem>>, vector<1x8x8xbf16>
    tpu.vector_store %arg10[%c0_12, %c0_13, %c0_14], %32 {strides = array<i32>} : memref<1x8x32xbf16, #tpu.memory_space<vmem>>, vector<1x8x8xbf16>,
    %34 = vector.extract_strided_slice %5 {offsets = [0, 8], sizes = [8, 8], strides = [1, 1]} : vector<8x96xbf16> to vector<8x8xbf16>
    %35 = vector.shape_cast %34 : vector<8x8xbf16> to vector<1x8x8xbf16>
    %36 = vector.extract_strided_slice %5 {offsets = [0, 40], sizes = [8, 8], strides = [1, 1]} : vector<8x96xbf16> to vector<8x8xbf16>
    %37 = vector.shape_cast %36 : vector<8x8xbf16> to vector<1x8x8xbf16>
    %38 = vector.extract_strided_slice %5 {offsets = [0, 72], sizes = [8, 8], strides = [1, 1]} : vector<8x96xbf16> to vector<8x8xbf16>
    %39 = vector.shape_cast %38 : vector<8x8xbf16> to vector<1x8x8xbf16>
    "tpu.trace_start"() <{level = 10 : i32, message = "bnd,bmd->bnm"}> : () -> ()
    %cst_15 = arith.constant dense<0.000000e+00> : vector<1x8x8xf32>
    %40 = tpu.matmul %35, %37, %cst_15 {dimension_numbers = #tpu.dot_dimension_numbers<[2], [2], [1], [1], [0, 0, 0, 1, 1, 1], [0], [0]>} : vector<1x8x8xbf16>, vector<1x8x8xbf16>, vector<1x8x8xf32> -> vector<1x8x8xf32>
    "tpu.trace_stop"() : () -> ()
    %cst_16 = arith.constant 0.353553385 : f32
    %41 = vector.broadcast %cst_16 : f32 to vector<1x8x8xf32>
    %42 = arith.mulf %40, %41 : vector<1x8x8xf32>
    %c1 = arith.constant 1 : index
    %c0_17 = arith.constant 0 : index
    %c0_18 = arith.constant 0 : index
    %43 = vector.load %arg4[%c1, %c0_17, %c0_18] : memref<4x8x8xbf16, #tpu.memory_space<vmem>>, vector<1x8x8xbf16>
    %44 = vector.shape_cast %43 : vector<1x8x8xbf16> to vector<8x8xbf16>
    %45 = arith.extf %44 : vector<8x8xbf16> to vector<8x8xf32>
    %46 = vector.shape_cast %45 : vector<8x8xf32> to vector<1x8x8xf32>
    %47 = arith.addf %42, %46 : vector<1x8x8xf32>
    %cst_19 = arith.constant dense<0xFF800000> : vector<1x8xf32>
    %48 = vector.multi_reduction <maximumf>, %47, %cst_19 [2] : vector<1x8x8xf32> to vector<1x8xf32>
    %49 = vector.shape_cast %48 : vector<1x8xf32> to vector<1x8x1xf32>
    %50 = vector.broadcast %49 : vector<1x8x1xf32> to vector<1x8x8xf32>
    %51 = arith.subf %47, %50 : vector<1x8x8xf32>
    %52 = math.exp %51 : vector<1x8x8xf32>
    %cst_20 = arith.constant dense<0.000000e+00> : vector<1x8xf32>
    %53 = vector.multi_reduction <add>, %52, %cst_20 [2] : vector<1x8x8xf32> to vector<1x8xf32>
    %54 = vector.shape_cast %53 : vector<1x8xf32> to vector<1x8x1xf32>
    %55 = tpu.reciprocal %54 {approx = true} : vector<1x8x1xf32> -> vector<1x8x1xf32>
    %56 = vector.broadcast %55 : vector<1x8x1xf32> to vector<1x8x8xf32>
    %57 = arith.mulf %52, %56 : vector<1x8x8xf32>
    %58 = arith.truncf %57 : vector<1x8x8xf32> to vector<1x8x8xbf16>
    "tpu.trace_start"() <{level = 10 : i32, message = "bnm,bmd->bnd"}> : () -> ()
    %cst_21 = arith.constant dense<0.000000e+00> : vector<1x8x8xf32>
    %59 = tpu.matmul %58, %39, %cst_21 {dimension_numbers = #tpu.dot_dimension_numbers<[2], [1], [1], [2], [0, 0, 0, 1, 1, 2], [0], [0]>} : vector<1x8x8xbf16>, vector<1x8x8xbf16>, vector<1x8x8xf32> -> vector<1x8x8xf32>
    "tpu.trace_stop"() : () -> ()
    %60 = arith.truncf %59 : vector<1x8x8xf32> to vector<1x8x8xbf16>
    %c0_22 = arith.constant 0 : index
    %c0_23 = arith.constant 0 : index
    %c8 = arith.constant 8 : index
    %61 = vector.load %arg10[%c0_22, %c0_23, %c8] : memref<1x8x32xbf16, #tpu.memory_space<vmem>>, vector<1x8x8xbf16>
    tpu.vector_store %arg10[%c0_22, %c0_23, %c8], %60 {strides = array<i32>} : memref<1x8x32xbf16, #tpu.memory_space<vmem>>, vector<1x8x8xbf16>,
    %62 = vector.extract_strided_slice %5 {offsets = [0, 16], sizes = [8, 8], strides = [1, 1]} : vector<8x96xbf16> to vector<8x8xbf16>
    %63 = vector.shape_cast %62 : vector<8x8xbf16> to vector<1x8x8xbf16>
    %64 = vector.extract_strided_slice %5 {offsets = [0, 48], sizes = [8, 8], strides = [1, 1]} : vector<8x96xbf16> to vector<8x8xbf16>
    %65 = vector.shape_cast %64 : vector<8x8xbf16> to vector<1x8x8xbf16>
    %66 = vector.extract_strided_slice %5 {offsets = [0, 80], sizes = [8, 8], strides = [1, 1]} : vector<8x96xbf16> to vector<8x8xbf16>
    %67 = vector.shape_cast %66 : vector<8x8xbf16> to vector<1x8x8xbf16>
    "tpu.trace_start"() <{level = 10 : i32, message = "bnd,bmd->bnm"}> : () -> ()
    %cst_24 = arith.constant dense<0.000000e+00> : vector<1x8x8xf32>
    %68 = tpu.matmul %63, %65, %cst_24 {dimension_numbers = #tpu.dot_dimension_numbers<[2], [2], [1], [1], [0, 0, 0, 1, 1, 1], [0], [0]>} : vector<1x8x8xbf16>, vector<1x8x8xbf16>, vector<1x8x8xf32> -> vector<1x8x8xf32>
    "tpu.trace_stop"() : () -> ()
    %cst_25 = arith.constant 0.353553385 : f32
    %69 = vector.broadcast %cst_25 : f32 to vector<1x8x8xf32>
    %70 = arith.mulf %68, %69 : vector<1x8x8xf32>
    %c2 = arith.constant 2 : index
    %c0_26 = arith.constant 0 : index
    %c0_27 = arith.constant 0 : index
    %71 = vector.load %arg4[%c2, %c0_26, %c0_27] : memref<4x8x8xbf16, #tpu.memory_space<vmem>>, vector<1x8x8xbf16>
    %72 = vector.shape_cast %71 : vector<1x8x8xbf16> to vector<8x8xbf16>
    %73 = arith.extf %72 : vector<8x8xbf16> to vector<8x8xf32>
    %74 = vector.shape_cast %73 : vector<8x8xf32> to vector<1x8x8xf32>
    %75 = arith.addf %70, %74 : vector<1x8x8xf32>
    %cst_28 = arith.constant dense<0xFF800000> : vector<1x8xf32>
    %76 = vector.multi_reduction <maximumf>, %75, %cst_28 [2] : vector<1x8x8xf32> to vector<1x8xf32>
    %77 = vector.shape_cast %76 : vector<1x8xf32> to vector<1x8x1xf32>
    %78 = vector.broadcast %77 : vector<1x8x1xf32> to vector<1x8x8xf32>
    %79 = arith.subf %75, %78 : vector<1x8x8xf32>
    %80 = math.exp %79 : vector<1x8x8xf32>
    %cst_29 = arith.constant dense<0.000000e+00> : vector<1x8xf32>
    %81 = vector.multi_reduction <add>, %80, %cst_29 [2] : vector<1x8x8xf32> to vector<1x8xf32>
    %82 = vector.shape_cast %81 : vector<1x8xf32> to vector<1x8x1xf32>
    %83 = tpu.reciprocal %82 {approx = true} : vector<1x8x1xf32> -> vector<1x8x1xf32>
    %84 = vector.broadcast %83 : vector<1x8x1xf32> to vector<1x8x8xf32>
    %85 = arith.mulf %80, %84 : vector<1x8x8xf32>
    %86 = arith.truncf %85 : vector<1x8x8xf32> to vector<1x8x8xbf16>
    "tpu.trace_start"() <{level = 10 : i32, message = "bnm,bmd->bnd"}> : () -> ()
    %cst_30 = arith.constant dense<0.000000e+00> : vector<1x8x8xf32>
    %87 = tpu.matmul %86, %67, %cst_30 {dimension_numbers = #tpu.dot_dimension_numbers<[2], [1], [1], [2], [0, 0, 0, 1, 1, 2], [0], [0]>} : vector<1x8x8xbf16>, vector<1x8x8xbf16>, vector<1x8x8xf32> -> vector<1x8x8xf32>
    "tpu.trace_stop"() : () -> ()
    %88 = arith.truncf %87 : vector<1x8x8xf32> to vector<1x8x8xbf16>
    %c0_31 = arith.constant 0 : index
    %c0_32 = arith.constant 0 : index
    %c16 = arith.constant 16 : index
    %89 = vector.load %arg10[%c0_31, %c0_32, %c16] : memref<1x8x32xbf16, #tpu.memory_space<vmem>>, vector<1x8x8xbf16>
    tpu.vector_store %arg10[%c0_31, %c0_32, %c16], %88 {strides = array<i32>} : memref<1x8x32xbf16, #tpu.memory_space<vmem>>, vector<1x8x8xbf16>,
    %90 = vector.extract_strided_slice %5 {offsets = [0, 24], sizes = [8, 8], strides = [1, 1]} : vector<8x96xbf16> to vector<8x8xbf16>
    %91 = vector.shape_cast %90 : vector<8x8xbf16> to vector<1x8x8xbf16>
    %92 = vector.extract_strided_slice %5 {offsets = [0, 56], sizes = [8, 8], strides = [1, 1]} : vector<8x96xbf16> to vector<8x8xbf16>
    %93 = vector.shape_cast %92 : vector<8x8xbf16> to vector<1x8x8xbf16>
    %94 = vector.extract_strided_slice %5 {offsets = [0, 88], sizes = [8, 8], strides = [1, 1]} : vector<8x96xbf16> to vector<8x8xbf16>
    %95 = vector.shape_cast %94 : vector<8x8xbf16> to vector<1x8x8xbf16>
    "tpu.trace_start"() <{level = 10 : i32, message = "bnd,bmd->bnm"}> : () -> ()
    %cst_33 = arith.constant dense<0.000000e+00> : vector<1x8x8xf32>
    %96 = tpu.matmul %91, %93, %cst_33 {dimension_numbers = #tpu.dot_dimension_numbers<[2], [2], [1], [1], [0, 0, 0, 1, 1, 1], [0], [0]>} : vector<1x8x8xbf16>, vector<1x8x8xbf16>, vector<1x8x8xf32> -> vector<1x8x8xf32>
    "tpu.trace_stop"() : () -> ()
    %cst_34 = arith.constant 0.353553385 : f32
    %97 = vector.broadcast %cst_34 : f32 to vector<1x8x8xf32>
    %98 = arith.mulf %96, %97 : vector<1x8x8xf32>
    %c3 = arith.constant 3 : index
    %c0_35 = arith.constant 0 : index
    %c0_36 = arith.constant 0 : index
    %99 = vector.load %arg4[%c3, %c0_35, %c0_36] : memref<4x8x8xbf16, #tpu.memory_space<vmem>>, vector<1x8x8xbf16>
    %100 = vector.shape_cast %99 : vector<1x8x8xbf16> to vector<8x8xbf16>
    %101 = arith.extf %100 : vector<8x8xbf16> to vector<8x8xf32>
    %102 = vector.shape_cast %101 : vector<8x8xf32> to vector<1x8x8xf32>
    %103 = arith.addf %98, %102 : vector<1x8x8xf32>
    %cst_37 = arith.constant dense<0xFF800000> : vector<1x8xf32>
    %104 = vector.multi_reduction <maximumf>, %103, %cst_37 [2] : vector<1x8x8xf32> to vector<1x8xf32>
    %105 = vector.shape_cast %104 : vector<1x8xf32> to vector<1x8x1xf32>
    %106 = vector.broadcast %105 : vector<1x8x1xf32> to vector<1x8x8xf32>
    %107 = arith.subf %103, %106 : vector<1x8x8xf32>
    %108 = math.exp %107 : vector<1x8x8xf32>
    %cst_38 = arith.constant dense<0.000000e+00> : vector<1x8xf32>
    %109 = vector.multi_reduction <add>, %108, %cst_38 [2] : vector<1x8x8xf32> to vector<1x8xf32>
    %110 = vector.shape_cast %109 : vector<1x8xf32> to vector<1x8x1xf32>
    %111 = tpu.reciprocal %110 {approx = true} : vector<1x8x1xf32> -> vector<1x8x1xf32>
    %112 = vector.broadcast %111 : vector<1x8x1xf32> to vector<1x8x8xf32>
    %113 = arith.mulf %108, %112 : vector<1x8x8xf32>
    %114 = arith.truncf %113 : vector<1x8x8xf32> to vector<1x8x8xbf16>
    "tpu.trace_start"() <{level = 10 : i32, message = "bnm,bmd->bnd"}> : () -> ()
    %cst_39 = arith.constant dense<0.000000e+00> : vector<1x8x8xf32>
    %115 = tpu.matmul %114, %95, %cst_39 {dimension_numbers = #tpu.dot_dimension_numbers<[2], [1], [1], [2], [0, 0, 0, 1, 1, 2], [0], [0]>} : vector<1x8x8xbf16>, vector<1x8x8xbf16>, vector<1x8x8xf32> -> vector<1x8x8xf32>
    "tpu.trace_stop"() : () -> ()
    %116 = arith.truncf %115 : vector<1x8x8xf32> to vector<1x8x8xbf16>
    %c0_40 = arith.constant 0 : index
    %c0_41 = arith.constant 0 : index
    %c24 = arith.constant 24 : index
    %117 = vector.load %arg10[%c0_40, %c0_41, %c24] : memref<1x8x32xbf16, #tpu.memory_space<vmem>>, vector<1x8x8xbf16>
    tpu.vector_store %arg10[%c0_40, %c0_41, %c24], %116 {strides = array<i32>} : memref<1x8x32xbf16, #tpu.memory_space<vmem>>, vector<1x8x8xbf16>,
    %c0_42 = arith.constant 0 : index
    %c0_43 = arith.constant 0 : index
    %c0_44 = arith.constant 0 : index
    %118 = vector.load %arg10[%c0_42, %c0_43, %c0_44] : memref<1x8x32xbf16, #tpu.memory_space<vmem>>, vector<1x8x32xbf16>
    %119 = vector.shape_cast %118 : vector<1x8x32xbf16> to vector<8x32xbf16>
    %c0_45 = arith.constant 0 : index
    %c0_46 = arith.constant 0 : index
    %120 = vector.load %arg3[%c0_45, %c0_46] : memref<32x32xbf16, #tpu.memory_space<vmem>>, vector<32x32xbf16>
    %cst_47 = arith.constant dense<0.000000e+00> : vector<8x32xf32>
    %121 = tpu.matmul %119, %120, %cst_47 {dimension_numbers = #tpu.dot_dimension_numbers<[1], [0], [0], [1], [0, 0, 1, 1], [], []>} : vector<8x32xbf16>, vector<32x32xbf16>, vector<8x32xf32> -> vector<8x32xf32>
    %cst_48 = arith.constant 1.000000e+00 : f32
    %122 = vector.broadcast %cst_48 : f32 to vector<8x32xf32>
    %123 = arith.subf %122, %121 : vector<8x32xf32>
    %124 = arith.mulf %1, %123 : vector<8x32xf32>
    %125 = arith.truncf %124 : vector<8x32xf32> to vector<8x32xbf16>
    %c0_49 = arith.constant 0 : index
    %c0_50 = arith.constant 0 : index
    %126 = vector.load %arg5[%c0_49, %c0_50] : memref<32x64xbf16, #tpu.memory_space<vmem>>, vector<32x64xbf16>
    %cst_51 = arith.constant dense<0.000000e+00> : vector<8x64xf32>
    %127 = tpu.matmul %125, %126, %cst_51 {dimension_numbers = #tpu.dot_dimension_numbers<[1], [0], [0], [1], [0, 0, 1, 1], [], []>} : vector<8x32xbf16>, vector<32x64xbf16>, vector<8x64xf32> -> vector<8x64xf32>
    %c0_52 = arith.constant 0 : index
    %c0_53 = arith.constant 0 : index
    %128 = vector.load %arg6[%c0_52, %c0_53] : memref<1x64xf32, #tpu.memory_space<vmem>>, vector<1x64xf32>
    %129 = vector.broadcast %128 : vector<1x64xf32> to vector<8x64xf32>
    %130 = arith.addf %127, %129 : vector<8x64xf32>
    %131 = arith.mulf %130, %130 : vector<8x64xf32>
    %132 = arith.mulf %130, %131 : vector<8x64xf32>
    %cst_54 = arith.constant 4.471500e-02 : f32
    %133 = vector.broadcast %cst_54 : f32 to vector<8x64xf32>
    %134 = arith.mulf %133, %132 : vector<8x64xf32>
    %135 = arith.addf %130, %134 : vector<8x64xf32>
    %cst_55 = arith.constant 0.797884583 : f32
    %136 = vector.broadcast %cst_55 : f32 to vector<8x64xf32>
    %137 = arith.mulf %136, %135 : vector<8x64xf32>
    %138 = math.tanh %137 : vector<8x64xf32>
    %cst_56 = arith.constant 1.000000e+00 : f32
    %139 = vector.broadcast %cst_56 : f32 to vector<8x64xf32>
    %140 = arith.addf %139, %138 : vector<8x64xf32>
    %cst_57 = arith.constant 5.000000e-01 : f32
    %141 = vector.broadcast %cst_57 : f32 to vector<8x64xf32>
    %142 = arith.mulf %141, %140 : vector<8x64xf32>
    %143 = arith.mulf %130, %142 : vector<8x64xf32>
    %144 = arith.truncf %143 : vector<8x64xf32> to vector<8x64xbf16>
    %c0_58 = arith.constant 0 : index
    %c0_59 = arith.constant 0 : index
    %145 = vector.load %arg7[%c0_58, %c0_59] : memref<64x32xbf16, #tpu.memory_space<vmem>>, vector<64x32xbf16>
    %cst_60 = arith.constant dense<0.000000e+00> : vector<8x32xf32>
    %146 = tpu.matmul %144, %145, %cst_60 {dimension_numbers = #tpu.dot_dimension_numbers<[1], [0], [0], [1], [0, 0, 1, 1], [], []>} : vector<8x64xbf16>, vector<64x32xbf16>, vector<8x32xf32> -> vector<8x32xf32>
    %c0_61 = arith.constant 0 : index
    %c0_62 = arith.constant 0 : index
    %147 = vector.load %arg8[%c0_61, %c0_62] : memref<1x32xf32, #tpu.memory_space<vmem>>, vector<1x32xf32>
    %148 = vector.broadcast %147 : vector<1x32xf32> to vector<8x32xf32>
    %149 = arith.addf %146, %148 : vector<8x32xf32>
    %cst_63 = arith.constant 1.000000e+00 : f32
    %150 = vector.broadcast %cst_63 : f32 to vector<8x32xf32>
    %151 = arith.subf %150, %149 : vector<8x32xf32>
    %152 = arith.mulf %124, %151 : vector<8x32xf32>
    %153 = vector.shape_cast %152 : vector<8x32xf32> to vector<1x8x32xf32>
    %c0_64 = arith.constant 0 : index
    %c0_65 = arith.constant 0 : index
    %c0_66 = arith.constant 0 : index
    %154 = vector.load %arg9[%c0_64, %c0_65, %c0_66] : memref<1x8x32xf32, #tpu.memory_space<vmem>>, vector<1x8x32xf32>
    tpu.vector_store %arg9[%c0_64, %c0_65, %c0_66], %153 {strides = array<i32>} : memref<1x8x32xf32, #tpu.memory_space<vmem>>, vector<1x8x32xf32>,
    return
  }
  func.func @transform_0(%arg0: i32) -> (i32, i32, i32) {
    %c0_i32 = arith.constant 0 : i32
    %c0_i32_0 = arith.constant 0 : i32
    %c0_i32_1 = arith.constant 0 : i32
    return %arg0, %c0_i32, %c0_i32_0 : i32, i32, i32
  }
  func.func @transform_1(%arg0: i32) -> (i32, i32) {
    %c0_i32 = arith.constant 0 : i32
    %c0_i32_0 = arith.constant 0 : i32
    %c0_i32_1 = arith.constant 0 : i32
    return %c0_i32, %c0_i32_0 : i32, i32
  }
  func.func @transform_2(%arg0: i32) -> (i32, i32) {
    %c0_i32 = arith.constant 0 : i32
    %c0_i32_0 = arith.constant 0 : i32
    %c0_i32_1 = arith.constant 0 : i32
    return %c0_i32, %c0_i32_0 : i32, i32
  }
  func.func @transform_3(%arg0: i32) -> (i32, i32, i32) {
    %c0_i32 = arith.constant 0 : i32
    %c0_i32_0 = arith.constant 0 : i32
    %c0_i32_1 = arith.constant 0 : i32
    %c0_i32_2 = arith.constant 0 : i32
    return %c0_i32, %c0_i32_0, %c0_i32_1 : i32, i32, i32
  }
  func.func @transform_4(%arg0: i32) -> (i32, i32) {
    %c0_i32 = arith.constant 0 : i32
    %c0_i32_0 = arith.constant 0 : i32
    %c0_i32_1 = arith.constant 0 : i32
    return %c0_i32, %c0_i32_0 : i32, i32
  }
  func.func @transform_5(%arg0: i32) -> (i32, i32) {
    %c0_i32 = arith.constant 0 : i32
    %c0_i32_0 = arith.constant 0 : i32
    %c0_i32_1 = arith.constant 0 : i32
    return %c0_i32, %c0_i32_0 : i32, i32
  }
  func.func @transform_6(%arg0: i32) -> (i32, i32) {
    %c0_i32 = arith.constant 0 : i32
    %c0_i32_0 = arith.constant 0 : i32
    %c0_i32_1 = arith.constant 0 : i32
    return %c0_i32, %c0_i32_0 : i32, i32
  }
  func.func @transform_7(%arg0: i32) -> (i32, i32) {
    %c0_i32 = arith.constant 0 : i32
    %c0_i32_0 = arith.constant 0 : i32
    %c0_i32_1 = arith.constant 0 : i32
    return %c0_i32, %c0_i32_0 : i32, i32
  }
  func.func @transform_8(%arg0: i32) -> (i32, i32, i32) {
    %c0_i32 = arith.constant 0 : i32
    %c0_i32_0 = arith.constant 0 : i32
    %c0_i32_1 = arith.constant 0 : i32
    return %arg0, %c0_i32, %c0_i32_0 : i32, i32, i32
  }
}

</mosaic_0001>

<bundles_post_ra>
// kernel: tpu_custom_call.1
= control target key start
LH: loop header
LB: loop body
LE: loop exit
PB: predicated region body
PF: predicated region fallthrough
CT: control target
= control target key end

     0   :  { %s2509_s0 = inlined_call_operand.hbm [shape: f32[2,8,32], index: 0, kind: input, shape index: {}]   ;;  %s2510_s1 = inlined_call_operand.hbm [shape: bf16[32,96], index: 1, kind: input, shape index: {}]   ;;  %s2511_s2 = inlined_call_operand.hbm [shape: bf16[32,32], index: 2, kind: input, shape index: {}]   ;;  %s2512_s3 = inlined_call_operand.hbm [shape: bf16[4,8,8], index: 3, kind: input, shape index: {}]   ;;  %s2513_s4 = inlined_call_operand.hbm [shape: bf16[32,64], index: 4, kind: input, shape index: {}]   ;;  %s2514_s5 = inlined_call_operand.hbm [shape: f32[1,64], index: 5, kind: input, shape index: {}]   ;;  %s2515_s6 = inlined_call_operand.hbm [shape: bf16[64,32], index: 6, kind: input, shape index: {}]   ;;  %s2516_s7 = inlined_call_operand.hbm [shape: f32[1,32], index: 7, kind: input, shape index: {}]   ;;  %s2517_s8 = inlined_call_operand.hbm [shape: f32[2,8,32], index: 8, kind: output, shape index: {}]  }
   0x1   :  { %2523 = sst [smem:[#allocation24_spill]] %s2510_s1 }
   0x2   :  { %13 = vsyncpa [#allocation4], 0 }
   0x3   :  { %15 = vsyncpa [#allocation4 + $0x1], 0 }
   0x4   :  { %16 = vsyncpa [#allocation7], 0 }
   0x5   :  { %17 = vsyncpa [#allocation10], 0 }
   0x6   :  { %18 = vsyncpa [#allocation13], 0 }
   0x7   :  { %19 = vsyncpa [#allocation16], 0 }
   0x8   :  { %20 = vsyncpa [#allocation5], 0 }
   0x9   :  { %22 = vsyncpa [#allocation5 + $0x1], 0  ;;  %s2064_s27 = smov 0   ;;  %s2066_s28 = smov 0  }
   0xa   :  { %s2068_s29 = smov 0   ;;  %s2070_s30 = smov 0  }
   0xb LB: > { %s1992_s9 = smov [#allocation6]   ;;  %s2085_s11 = sadd.s32 4294967295, %s1990_s30   ;;  %s1990_s30 = sphi %s2070_s30, %s2549_s30   ;;  %s1986_s29 = sphi %s2068_s29, %s2548_s29   ;;  %s1982_s28 = sphi %s2066_s28, %s2547_s28   ;;  %s1978_s27 = sphi %s2064_s27, %s2546_s27  }
   0xc   : > { %s244_s10 = sshll.u32 %s1992_s9, 4  ;;  %p1350_p0 = scmp.ge.s32.totalorder %s1990_s30, 1  ;;  %s2090_s10 = int_to_ptr.vmem [resolvable:$true] %s244_s10 }
   0xd   : > { %p2520_p1 = scmp.eq.s32.totalorder %s2085_s11, 0  ;;  %p232_p2 = scmp.lt.s32.totalorder %s1990_s30, 3 }
   0xe   : > { %s1993_s13 = smov [#allocation9]   ;;  %s1994_s16 = smov [#allocation12]  }
   0xf   : > { %p2092_p3 = pnand %p1350_p0, %p232_p2  ;;  %s270_s14 = sshll.u32 %s1993_s13, 4  ;;  %s2105_s14 = int_to_ptr.vmem [resolvable:$true] %s270_s14 }
  0x10   : > { %s297_s17 = sshll.u32 %s1994_s16, 4  ;;  %s2526_s1 = sld [smem:[#allocation24_spill]]  ;;  %s2107_s17 = int_to_ptr.vmem [resolvable:$true] %s297_s17 }
  0x11   : > { %s2524_s12 = scalar_select %p2092_p3, 1, 0 }
  0x12   : > { %p1551_p5 = pneg %p2092_p3 }
  0x14   : > { %p2101_p6 = pnand %p1551_p5, %p2520_p1 }
  0x16   : > { %s1682_s20 = scalar_lea.hbm %s2526_s1, 256  ;;  %p2117_p8 = pneg %p2101_p6 }
  0x17   : > { %p1683_p7 = scmp.ne.s32.totalorder %s2526_s1, %s1682_s20  ;;  %p1689_p11 = scmp.lt.u32.totalorder %s1682_s20, %s2526_s1 }
  0x19   : > { %p1685_p9 = pnand %p2117_p8, %p1683_p7 }
  0x1b   : > { %p1686_p10 = pneg %p1685_p9 }
  0x1d   : > { %p1691_p12 = pnand %p1689_p11, %p1686_p10 }
  0x1f   : > { %1694 = shalt.err (!%p1691_p12)
}
  0x20   : > { %s1695_s26 = scalar_lea.vmem %s2090_s10, 256  ;;  %p1703_p5 = scmp.lt.s32.totalorder %s2090_s10, %s2090_s10 }
  0x21   : > { %p1696_p13 = scmp.ne.s32.totalorder %s2090_s10, %s1695_s26  ;;  %p1704_p4 = scmp.lt.s32.totalorder %s1695_s26, %s1695_s26 }
  0x23   : > { %p1698_p0 = pnand %p1696_p13, %p2117_p8  ;;  %p1705_p7 = por %p1704_p4, %p1703_p5 }
  0x25   : > { %p1699_p2 = pneg %p1698_p0 }
  0x27   : > { %p1706_p9 = pnand %p1705_p7, %p1699_p2 }
  0x29   : > { %1709 = shalt.err (!%p1706_p9)
}
  0x2a   : > { %s2518_s9 = smov 64   ;;  %s1996_s13 = smov 4  }
  0x2b   : > { %1554 = dma.hbm_to_vmem [thread:$0]  (!%p2101_p6), %s2526_s1, 256, %s2090_s10, [#allocation7], %s2518_s9, %s2518_s9, %s1996_s13  }
  0x2c   : > { %s1710_s21 = scalar_lea.hbm %s2512_s3, 256 }
  0x2d   : > { %p1711_p4 = scmp.ne.s32.totalorder %s2512_s3, %s1710_s21  ;;  %p1717_p12 = scmp.lt.u32.totalorder %s1710_s21, %s2512_s3 }
  0x2f   : > { %p1713_p10 = pnand %p1711_p4, %p2117_p8 }
  0x31   : > { %p1714_p11 = pneg %p1713_p10 }
  0x33   : > { %p1719_p13 = pnand %p1717_p12, %p1714_p11 }
  0x35   : > { %1722 = shalt.err (!%p1719_p13)
}
  0x36   : > { %s1723_s10 = scalar_lea.vmem %s2105_s14, 256  ;;  %p1731_p7 = scmp.lt.s32.totalorder %s2105_s14, %s2105_s14 }
  0x37   : > { %p1724_p0 = scmp.ne.s32.totalorder %s2105_s14, %s1723_s10  ;;  %p1732_p9 = scmp.lt.s32.totalorder %s1723_s10, %s1723_s10 }
  0x39   : > { %p1726_p2 = pnand %p1724_p0, %p2117_p8  ;;  %p1733_p4 = por %p1732_p9, %p1731_p7 }
  0x3b   : > { %p1727_p5 = pneg %p1726_p2 }
  0x3d   : > { %p1734_p10 = pnand %p1733_p4, %p1727_p5 }
  0x3f   : > { %1737 = shalt.err (!%p1734_p10)
}
  0x40   : > { %1560 = dma.hbm_to_vmem [thread:$0]  (!%p2101_p6), %s2512_s3, 256, %s2105_s14, [#allocation10], %s2518_s9, %s2518_s9, %s1996_s13  }
  0x41   : > { %s1738_s21 = scalar_lea.hbm %s2514_s5, 16 }
  0x42   : > { %p1739_p11 = scmp.ne.s32.totalorder %s2514_s5, %s1738_s21  ;;  %p1745_p0 = scmp.lt.u32.totalorder %s1738_s21, %s2514_s5 }
  0x44   : > { %p1741_p12 = pnand %p1739_p11, %p2117_p8 }
  0x46   : > { %p1742_p13 = pneg %p1741_p12 }
  0x48   : > { %p1747_p2 = pnand %p1745_p0, %p1742_p13 }
  0x4a   : > { %1750 = shalt.err (!%p1747_p2)
}
  0x4b   : > { %s1751_s14 = scalar_lea.vmem %s2107_s17, 16  ;;  %s1758_s10 = scalar_lea.vmem %s2107_s17, 32 }
  0x4c   : > { %p1752_p5 = scmp.ne.s32.totalorder %s2107_s17, %s1751_s14  ;;  %p1759_p4 = scmp.lt.s32.totalorder %s2107_s17, %s2107_s17 }
  0x4d   : > { %p1760_p10 = scmp.lt.s32.totalorder %s1758_s10, %s1751_s14 }
  0x4e   : > { %p1754_p7 = pnand %p1752_p5, %p2117_p8 }
  0x4f   : > { %p1761_p11 = por %p1760_p10, %p1759_p4 }
  0x50   : > { %p1755_p9 = pneg %p1754_p7 }
  0x52   : > { %p1762_p12 = pnand %p1761_p11, %p1755_p9 }
  0x54   : > { %1765 = shalt.err (!%p1762_p12)
}
  0x55   : > { %1566 = dma.hbm_to_vmem [thread:$0]  (!%p2101_p6), %s2514_s5, 16, %s2107_s17, [#allocation13]  }
  0x56   : > { %s1997_s19 = smov [#allocation8]   ;;  %s1998_s21 = smov [#allocation11]  }
  0x57   : > { %s257_s20 = sshll.u32 %s1997_s19, 4  ;;  %s283_s22 = sshll.u32 %s1998_s21, 4  ;;  %s258_s20 = int_to_ptr.vmem [resolvable:$true] %s257_s20  ;;  %s284_s22 = int_to_ptr.vmem [resolvable:$true] %s283_s22 }
  0x58   : > { %s1766_s26 = scalar_lea.hbm %s2511_s2, 256 }
  0x59   : > { %p1767_p13 = scmp.ne.s32.totalorder %s2511_s2, %s1766_s26  ;;  %p1773_p5 = scmp.lt.u32.totalorder %s1766_s26, %s2511_s2 }
  0x5b   : > { %p1769_p0 = pnand %p1767_p13, %p2117_p8 }
  0x5d   : > { %p1770_p2 = pneg %p1769_p0 }
  0x5f   : > { %p1775_p7 = pnand %p1773_p5, %p1770_p2 }
  0x61   : > { %1778 = shalt.err (!%p1775_p7)
}
  0x62   : > { %s1779_s17 = scalar_lea.vmem %s258_s20, 256  ;;  %p1787_p11 = scmp.lt.s32.totalorder %s258_s20, %s258_s20 }
  0x63   : > { %p1780_p9 = scmp.ne.s32.totalorder %s258_s20, %s1779_s17  ;;  %p1788_p12 = scmp.lt.s32.totalorder %s1779_s17, %s1779_s17 }
  0x65   : > { %p1782_p4 = pnand %p1780_p9, %p2117_p8  ;;  %p1789_p1 = por %p1788_p12, %p1787_p11 }
  0x67   : > { %p1783_p10 = pneg %p1782_p4 }
  0x69   : > { %p1790_p3 = pnand %p1789_p1, %p1783_p10 }
  0x6b   : > { %1793 = shalt.err (!%p1790_p3)
}
  0x6c   : > { %s2528_s18 = smov 64   ;;  %s1794_s25 = scalar_lea.hbm %s2513_s4, 256 }
  0x6d   : > { %1557 = dma.hbm_to_vmem [thread:$0]  (!%p2101_p6), %s2511_s2, 256, %s258_s20, [#allocation7], %s2528_s18, %s2528_s18, %s1996_s13  }
  0x6e   : > { %p1795_p1 = scmp.ne.s32.totalorder %s2513_s4, %s1794_s25  ;;  %p1801_p0 = scmp.lt.u32.totalorder %s1794_s25, %s2513_s4 }
  0x70   : > { %p1797_p3 = pnand %p1795_p1, %p2117_p8 }
  0x72   : > { %p1798_p13 = pneg %p1797_p3 }
  0x74   : > { %p1803_p2 = pnand %p1801_p0, %p1798_p13 }
  0x76   : > { %1806 = shalt.err (!%p1803_p2)
}
  0x77   : > { %s1807_s17 = scalar_lea.vmem %s284_s22, 256  ;;  %p1815_p4 = scmp.lt.s32.totalorder %s284_s22, %s284_s22 }
  0x78   : > { %p1808_p5 = scmp.ne.s32.totalorder %s284_s22, %s1807_s17  ;;  %p1816_p10 = scmp.lt.s32.totalorder %s1807_s17, %s1807_s17 }
  0x7a   : > { %p1810_p7 = pnand %p1808_p5, %p2117_p8  ;;  %p1817_p11 = por %p1816_p10, %p1815_p4 }
  0x7c   : > { %p1811_p9 = pneg %p1810_p7 }
  0x7e   : > { %p1818_p12 = pnand %p1817_p11, %p1811_p9 }
  0x80   : > { %1821 = shalt.err (!%p1818_p12)
}
  0x81   : > { %1563 = dma.hbm_to_vmem [thread:$0]  (!%p2101_p6), %s2513_s4, 256, %s284_s22, [#allocation10], %s2528_s18, %s2528_s18, %s1996_s13  }
  0x82   : > { %s1999_s19 = smov [#allocation14]   ;;  %s2000_s24 = smov [#allocation15]  }
  0x83   : > { %s307_s21 = sshll.u32 %s1999_s19, 4  ;;  %s321_s25 = sshll.u32 %s2000_s24, 4  ;;  %s308_s21 = int_to_ptr.vmem [resolvable:$true] %s307_s21  ;;  %s322_s25 = int_to_ptr.vmem [resolvable:$true] %s321_s25 }
  0x84   : > { %s1822_s10 = scalar_lea.hbm %s2515_s6, 512 }
  0x85   : > { %p1823_p1 = scmp.ne.s32.totalorder %s2515_s6, %s1822_s10  ;;  %p1829_p0 = scmp.lt.u32.totalorder %s1822_s10, %s2515_s6 }
  0x87   : > { %p1825_p3 = pnand %p1823_p1, %p2117_p8 }
  0x89   : > { %p1826_p13 = pneg %p1825_p3 }
  0x8b   : > { %p1831_p2 = pnand %p1829_p0, %p1826_p13 }
  0x8d   : > { %1834 = shalt.err (!%p1831_p2)
}
  0x8e   : > { %s1835_s22 = scalar_lea.vmem %s308_s21, 512  ;;  %p1843_p4 = scmp.lt.s32.totalorder %s308_s21, %s308_s21 }
  0x8f   : > { %p1836_p5 = scmp.ne.s32.totalorder %s308_s21, %s1835_s22  ;;  %p1844_p10 = scmp.lt.s32.totalorder %s1835_s22, %s1835_s22 }
  0x91   : > { %p1838_p7 = pnand %p1836_p5, %p2117_p8  ;;  %p1845_p11 = por %p1844_p10, %p1843_p4 }
  0x93   : > { %p1839_p9 = pneg %p1838_p7 }
  0x95   : > { %p1846_p12 = pnand %p1845_p11, %p1839_p9 }
  0x97   : > { %1849 = shalt.err (!%p1846_p12)
}
  0x98   : > { %1569 = dma.hbm_to_vmem [thread:$0]  (!%p2101_p6), %s2515_s6, 512, %s308_s21, [#allocation13], %s2528_s18, %s2528_s18, %s1996_s13  }
  0x99   : > { %s1850_s26 = scalar_lea.hbm %s2516_s7, 16 }
  0x9a   : > { %p1851_p1 = scmp.ne.s32.totalorder %s2516_s7, %s1850_s26  ;;  %p1857_p0 = scmp.lt.u32.totalorder %s1850_s26, %s2516_s7 }
  0x9c   : > { %p1853_p3 = pnand %p1851_p1, %p2117_p8 }
  0x9e   : > { %p1854_p13 = pneg %p1853_p3 }
  0xa0   : > { %p1859_p2 = pnand %p1857_p0, %p1854_p13 }
  0xa2   : > { %1862 = shalt.err (!%p1859_p2)
}
  0xa3   : > { %s1863_s20 = scalar_lea.vmem %s322_s25, 16  ;;  %s1870_s13 = scalar_lea.vmem %s322_s25, 32 }
  0xa4   : > { %p1864_p5 = scmp.ne.s32.totalorder %s322_s25, %s1863_s20  ;;  %p1871_p4 = scmp.lt.s32.totalorder %s322_s25, %s322_s25 }
  0xa5   : > { %p1872_p10 = scmp.lt.s32.totalorder %s1870_s13, %s1863_s20 }
  0xa6   : > { %p1866_p7 = pnand %p1864_p5, %p2117_p8 }
  0xa7   : > { %p1873_p11 = por %p1872_p10, %p1871_p4 }
  0xa8   : > { %p1867_p9 = pneg %p1866_p7 }
  0xaa   : > { %p1874_p12 = pnand %p1873_p11, %p1867_p9 }
  0xac   : > { %1877 = shalt.err (!%p1874_p12)
}
  0xad   : > { %1572 = dma.hbm_to_vmem [thread:$0]  (!%p2101_p6), %s2516_s7, 16, %s322_s25, [#allocation16]  }
  0xae   : > { %s1349_s23 = sadd.s32 4294967294, %s1990_s30   ;;  %s2274_s15 = sadd.s32 1, %s1990_s30  }
  0xaf   : > { %s35_s22 = sadd.s32 1, %s1986_s29  ;;  %s32_s1 = ssub.s32 %s1990_s30, %s2274_s15 }
  0xb0   : > { %p42_p8 = scmp.ne.s32.totalorder %s1986_s29, %s1982_s28  ;;  %p33_p1 = scmp.eq.s32.totalorder %s32_s1, 0 }
  0xb1   : > { %p43_p3 = scmp.eq.s32.totalorder %s1990_s30, 0  ;;  %p48_p13 = scmp.ne.s32.totalorder %s1982_s28, %s1978_s27 }
  0xb2   : > { %p219_p0 = scmp.eq.s32.totalorder %s2085_s11, 1  ;;  %p2529_p5 = scmp.eq.s32.totalorder %s2085_s11, 0 }
  0xb3   : > { %s2286_s9 = scalar_select %p33_p1, %s1986_s29, %s35_s22  }
  0xb4   : > { %p44_p2 = por %p43_p3, %p42_p8  ;;  %p2290_p7 = por %p2529_p5, %p48_p13 }
  0xb5   : > { %p2294_p6 = por %p219_p0, %p42_p8  ;;  %p225_p9 = scmp.eq.s32.totalorder %s1349_s23, 1 }
  0xb6   : > { %p1588_p4 = scmp.lt.s32.totalorder %s1990_s30, 2  ;;  %s332_s24 = sand.u32 1, %s1986_s29  }
  0xb7   : > { %s2531_s25 = scalar_select %p2294_p6, 1, 0 }
  0xb8   : > { %p2300_p10 = por %p225_p9, %p48_p13  ;;  %s1359_s14 = sshll.u32 %s332_s24, 3 }
  0xb9   : > { %s1360_s10 = sshll.u32 %s1990_s30, 7  ;;  %s336_s13 = scalar_lea.vmem [#allocation3], %s1359_s14 }
  0xba   : > { %s2532_s26 = scalar_select %p2300_p10, 1, 0 }
  0xbb   : > { %s2308_s20 = scalar_lea.hbm %s2509_s0, %s1360_s10  ;;  %s343_s18 = sshll.u32 %s336_s13, 4  ;;  %s2314_s18 = int_to_ptr.vmem [resolvable:$true] %s343_s18 }
  0xbc   : > { %p2310_p11 = pnand %p1588_p4, %p44_p2  ;;  %s333_s23 = scalar_lea.sflag [#allocation4], %s332_s24 }
  0xbd   : > { %s1878_s22 = scalar_lea.hbm %s2308_s20, 128  ;;  %s1883_s10 = scalar_lea.hbm %s2509_s0, 256 }
  0xbe   : > { %p1879_p12 = scmp.ne.s32.totalorder %s2308_s20, %s1878_s22  ;;  %p1880_p8 = pneg %p2310_p11 }
  0xbf   : > { %p1884_p13 = scmp.lt.u32.totalorder %s2308_s20, %s2509_s0  ;;  %p1885_p0 = scmp.lt.u32.totalorder %s1883_s10, %s1878_s22 }
  0xc0   : > { %p1881_p1 = pnand %p1880_p8, %p1879_p12  ;;  %p1887_p5 = scmp.lt.u32.totalorder %s1878_s22, %s2308_s20 }
  0xc1   : > { %p1886_p2 = por %p1885_p0, %p1884_p13 }
  0xc2   : > { %p1882_p3 = pneg %p1881_p1 }
  0xc3   : > { %p1888_p9 = por %p1887_p5, %p1886_p2 }
  0xc5   : > { %p1889_p4 = pnand %p1888_p9, %p1882_p3 }
  0xc7   : > { %1892 = shalt.err (!%p1889_p4)
}
  0xc8   : > { %s1893_s24 = scalar_lea.vmem %s2314_s18, 128  ;;  %s2001_s13 = smov [#allocation3]  }
  0xc9   : > { %p1894_p12 = scmp.ne.s32.totalorder %s2314_s18, %s1893_s24  ;;  %s1898_s1 = sshll.u32 %s2001_s13, 4  ;;  %s1899_s1 = int_to_ptr.vmem [resolvable:$false] %s1898_s1 }
  0xca   : > { %s1900_s14 = scalar_lea.vmem %s1899_s1, 256  ;;  %p1901_p6 = scmp.lt.s32.totalorder %s2314_s18, %s1899_s1 }
  0xcb   : > { %p1896_p1 = pnand %p1894_p12, %p1880_p8  ;;  %p1902_p13 = scmp.lt.s32.totalorder %s1900_s14, %s1893_s24 }
  0xcd   : > { %p1897_p10 = pneg %p1896_p1  ;;  %p1903_p0 = por %p1902_p13, %p1901_p6 }
  0xcf   : > { %p1904_p2 = pnand %p1903_p0, %p1897_p10 }
  0xd1   : > { %1907 = shalt.err (!%p1904_p2)
}
  0xd2   : > { %1576 = dma.hbm_to_vmem [thread:$0]  (!%p2310_p11), %s2308_s20, 128, %s2314_s18, %s333_s23  }
  0xd3   : > { %p2534_p3 = scmp.ne.s32.totalorder %s2524_s12, 0 }
  0xd4   : > { %s2344_s22 = sand.u32 (!%p2534_p3), 1, %s1982_s28  }
  0xd5   : > { %352 = sbr.rel (%p2534_p3) target bundleno = 2204 (0x89c), region = 52  ;;  %s1362_s10 = sshll.u32 (!%p2534_p3), %s2344_s22, 3 }
  0xd6   : > { %s355_s16 = scalar_lea.sflag (!%p2534_p3), [#allocation4], %s2344_s22  ;;  %s358_s17 = scalar_lea.vmem (!%p2534_p3), [#allocation3], %s1362_s10 }
  0xdc   : > { %1953 = dma.done.wait (%p2290_p7), %s355_s16, 128  }
  0xdd   : > { %1955 = vsyncadd (%p2290_p7), %s355_s16, 4294967168  ;;  %p2535_p6 = scmp.eq.s32.totalorder %s2085_s11, 0 }
  0xdf   : > { %1957 = dma.done.wait (%p2535_p6), [#allocation7], 512   ;;  %p2536_p10 = pmov %p2535_p6 }
  0xe0   : > { %p2537_p11 = pmov %p2535_p6 }
  0xe1   : > { %1959 = vsyncadd (%p2536_p10), [#allocation7], 4294966784 }
  0xe2   : > { %1961 = dma.done.wait (%p2537_p11), [#allocation10], 512   ;;  %p2538_p8 = pmov %p2535_p6 }
  0xe3   : > { %p2539_p5 = pmov %p2535_p6 }
  0xe4   : > { %1963 = vsyncadd (%p2538_p8), [#allocation10], 4294966784 }
  0xe5   : > { %1965 = dma.done.wait (%p2539_p5), [#allocation13], 528   ;;  %p2540_p9 = pmov %p2539_p5 }
  0xe6   : > { %p2541_p7 = pmov %p2539_p5 }
  0xe7   : > { %1967 = vsyncadd (%p2540_p9), [#allocation13], 4294966768 }
  0xe8   : > { %1969 = dma.done.wait (%p2541_p7), [#allocation16], 16   ;;  %p2542_p4 = pmov %p2539_p5 }
  0xe9   : > { %v2002_v0 = vmov 0.0   ;;  %vm2003_vm0 = vmmov 0   ;;  %v1654_v1 = vld [vmem:[#allocation6] sm:$0xff]   ;;  %v1655_v2 = vld [vmem:[#allocation6 + $0x8] sm:$0xff]   ;;  %v2376_v3 = vld [vmem:[%s358_s17] sm:$0xff]  ;;  %vm438_vm1 = vcmask 261120  }
  0xea   : > { %1971 = vsyncadd (%p2542_p4), [#allocation16], 4294967280  ;;  %1435 = vmatprep.subr.bf16.mxu0 %v2002_v0  ;;  %1439 = vmatprep.mubr.msk.bf16.mxu0 %vm2003_vm0, %v2002_v0  ;;  %v421_v4 = vpack.c.bf16 %v2376_v3, %v2376_v3  ;;  %s2004_s12 = smov 120   ;;  %s2005_s19 = smov 96   ;;  %vm486_vm2 = vcmask 64512   ;;  %v534_v21 = vld [vmem:[#allocation9] sm:$0xff]  }
  0xeb   : > { %1443 = vmatprep.subr.bf16.mxu1 %v2002_v0  ;;  %1445 = vmatprep.mubr.msk.bf16.mxu1 %vm2003_vm0, %v2002_v0  ;;  %s2006_s20 = smov 80   ;;  %s2007_s18 = smov 88   ;;  %v535_v22 = vunpack.c.l.bf16 %v534_v21  ;;  %v654_v30 = vunpack.c.h.bf16 %v534_v21  ;;  %v777_v37 = vld [vmem:[#allocation9 + $0x8] sm:$0xff]   ;;  %vm554_vm3 = vcmask 1043456   ;;  %vm599_vm4 = vcmask 60416  }
  0xec   : > { %1436 = vmatpush3.bf16.msra.mxu0 %v1654_v1  ;;  %s2008_s21 = smov 72   ;;  %s2009_s23 = smov 112   ;;  %v778_v39 = vunpack.c.l.bf16 %v777_v37  ;;  %v902_v47 = vunpack.c.h.bf16 %v777_v37  ;;  %vm723_vm5 = vcmask 126016   ;;  %vm847_vm6 = vcmask 191616  }
  0xed   : > { %1437 = vmatprep.subr.bf16.mxu0 %v2002_v0  ;;  %s2010_s24 = smov 104   ;;  %s2011_s13 = smov 56   ;;  %vm971_vm7 = vcmask 257216   ;;  %vm1151_vm8 = vcmask 523264  }
  0xee   : > { %s2012_s1 = smov 64   ;;  %s2013_s14 = smov 40  }
  0xef   : > { %s2014_s16 = smov 48   ;;  %s2015_s17 = smov 8  }
  0xf0   : > { %1438 = vmatpush3.bf16.msra.mxu0 %v1655_v2  ;;  %p2543_p1 = scmp.ne.s32.totalorder %s2531_s25, 0 }
  0xf1   : > { %1449 = vmatprep.subr.bf16.mxu0 %v2002_v0 }
  0xf3   : > { %1440 = vmatmul.mubr.msk.bf16.vlgmr.msra.gmra.mrb[0].mxu0 %vm438_vm1, %v421_v4 }
  0xf4   : > { %1451 = vmatprep.mubr.msk.bf16.mxu0 %vm2003_vm0, %v2002_v0 }
 0x1c6   : > { %v476_v5 = vpop.f32.mrb[0].mxu0 }
 0x1c7   : > { %v2385_v6 = vpack.c.bf16 %v476_v5, %v476_v5  ;;  %v1441_v7 = vpop.f32.mrb[1].mxu0 }
 0x1c8   : > { %v479_v8 = vpop.f32.mrb[2].mxu0 }
 0x1c9   : > { %601 = vrot.lane.b32.xlu1 %v2385_v6, %s2004_s12  ;;  %484 = vrot.lane.b32.xlu0 %v2385_v6, %s2005_s19  ;;  %v1442_v9 = vpop.f32.mrb[3].mxu0  ;;  %s2016_s12 = smov 16   ;;  %s2017_s19 = smov 24  }
 0x1cd   : > { %727 = vrot.lane.b32.xlu1 %v2385_v6, %s2006_s20  ;;  %603 = vrot.lane.b32.xlu0 %v2385_v6, %s2007_s18  ;;  %s1399_s20 = sshll.u32 %s2085_s11, 7  ;;  %s418_s18 = scalar_lea.vmem [#allocation17], %s1362_s10 }
 0x1ce   : > { %s2018_s10 = smov [#allocation17]  }
 0x1d1   : > { %851 = vrot.lane.b32.xlu1 %v2385_v6, %s2008_s21  ;;  %725 = vrot.lane.b32.xlu0 %v2385_v6, %s2009_s23  ;;  %s1212_s21 = sshll.u32 %s418_s18, 4  ;;  %s2466_s21 = int_to_ptr.vmem [resolvable:$true] %s1212_s21 }
 0x1d2   : > { %s1908_s11 = scalar_lea.vmem %s2466_s21, 128 }
 0x1d3   : > { %p1909_p12 = scmp.ne.s32.totalorder %s2466_s21, %s1908_s11 }
 0x1d5   : > { %849 = vrot.lane.b32.xlu0 %v2385_v6, %s2010_s24  ;;  %p1910_p13 = pnand %p1909_p12, %p2543_p1 }
 0x1d7   : > { %p1911_p0 = pneg %p1910_p13 }
 0x23b   : > { %v485_v10 = vpop.permute.xlu0 %484  ;;  %v602_v13 = vpop.permute.xlu1 %601 }
 0x23c   : > { %v491_v11 = vsel %vm486_vm2, %v485_v10, 0 }
 0x23d   : > { %1444 = vmatpush3.bf16.xpose.msra.mxu1 %v491_v11 }
 0x23e   : > { %1455 = vmatprep.subr.bf16.mxu1 %v2002_v0 }
 0x23f   : > { %v604_v12 = vpop.permute.xlu0 %603  ;;  %v728_v15 = vpop.permute.xlu1 %727 }
 0x240   : > { %v609_v14 = vsel %vm486_vm2, %v604_v12, 0  ;;  %v733_v16 = vsel %vm486_vm2, %v728_v15, 0 }
 0x243   : > { %v852_v17 = vpop.permute.xlu1 %851  ;;  %v726_v18 = vpop.permute.xlu0 %725 }
 0x244   : > { %1446 = vmatmul.mubr.msk.bf16.vlgmr.msra.gmra.mrb[0].mxu1 %vm486_vm2, %v2385_v6  ;;  %v857_v19 = vsel %vm486_vm2, %v852_v17, 0 }
 0x245   : > { %1456 = vmatpush3.bf16.xpose.msra.mxu1 %v609_v14  ;;  %1457 = vmatprep.mubr.msk.bf16.mxu1 %vm2003_vm0, %v2002_v0 }
 0x246   : > { %1467 = vmatprep.subr.bf16.mxu1 %v2002_v0 }
 0x247   : > { %v850_v20 = vpop.permute.xlu0 %849 }
 0x24c   : > { %1458 = vmatmul.mubr.msk.bf16.vlgmr.msra.gmra.mrb[4].mxu1 %vm486_vm2, %v602_v13 }
 0x24d   : > { %1468 = vmatpush3.bf16.xpose.msra.mxu1 %v733_v16  ;;  %1469 = vmatprep.mubr.msk.bf16.mxu1 %vm2003_vm0, %v2002_v0 }
 0x24e   : > { %1479 = vmatprep.subr.bf16.mxu1 %v2002_v0 }
 0x254   : > { %1470 = vmatmul.mubr.msk.bf16.vlgmr.msra.gmra.mrb[8].mxu1 %vm486_vm2, %v726_v18 }
 0x255   : > { %1480 = vmatpush3.bf16.xpose.msra.mxu1 %v857_v19  ;;  %1481 = vmatprep.mubr.msk.bf16.mxu1 %vm2003_vm0, %v2002_v0 }
 0x256   : > { %1491 = vmatprep.subr.bf16.mxu1 %v2002_v0 }
 0x25c   : > { %1482 = vmatmul.mubr.msk.bf16.vlgmr.msra.gmra.mrb[12].mxu1 %vm486_vm2, %v850_v20 }
 0x25d   : > { %1495 = vmatprep.mubr.msk.bf16.mxu1 %vm2003_vm0, %v2002_v0 }
 0x317   : > { %v527_v23 = vpop.f32.mrb[0].mxu1 }
 0x318   : > { %v533_v24 = vmul.f32 0.35355338, %v527_v23  ;;  %v1447_v25 = vpop.f32.mrb[1].mxu1 }
 0x319   : > { %v530_v26 = vpop.f32.mrb[2].mxu1 }
 0x31a   : > { %v1448_v27 = vpop.f32.mrb[3].mxu1  ;;  %v536_v28 = vadd.f32 %v535_v22, %v533_v24 }
 0x31c   : > { %v537_v29 = vsel %vm486_vm2, %v536_v28, -inf }
 0x31d   : > { %538 = vmax.xlane.f32.xlu1 %v537_v29 }
 0x31f   : > { %v645_v31 = vpop.f32.mrb[4].mxu1 }
 0x320   : > { %v651_v32 = vmul.f32 0.35355338, %v645_v31  ;;  %v1459_v33 = vpop.f32.mrb[5].mxu1 }
 0x321   : > { %v648_v34 = vpop.f32.mrb[6].mxu1 }
 0x322   : > { %v1460_v35 = vpop.f32.mrb[7].mxu1  ;;  %v655_v36 = vadd.f32 %v654_v30, %v651_v32 }
 0x324   : > { %v656_v38 = vsel %vm486_vm2, %v655_v36, -inf }
 0x325   : > { %657 = vmax.xlane.f32.xlu0 %v656_v38 }
 0x327   : > { %v769_v40 = vpop.f32.mrb[8].mxu1 }
 0x328   : > { %v775_v41 = vmul.f32 0.35355338, %v769_v40  ;;  %v1471_v42 = vpop.f32.mrb[9].mxu1 }
 0x329   : > { %v772_v43 = vpop.f32.mrb[10].mxu1 }
 0x32a   : > { %v1472_v44 = vpop.f32.mrb[11].mxu1  ;;  %v779_v45 = vadd.f32 %v778_v39, %v775_v41 }
 0x32c   : > { %v780_v46 = vsel %vm486_vm2, %v779_v45, -inf }
 0x32d   : > { %781 = vmax.xlane.f32.xlu0 %v780_v46 }
 0x32f   : > { %v893_v48 = vpop.f32.mrb[12].mxu1 }
 0x330   : > { %v899_v49 = vmul.f32 0.35355338, %v893_v48  ;;  %v1483_v50 = vpop.f32.mrb[13].mxu1  ;;  %v1657_v48 = vld [vmem:[#allocation8 + $0x8] sm:$0xff]  }
 0x331   : > { %v896_v51 = vpop.f32.mrb[14].mxu1 }
 0x332   : > { %v1484_v52 = vpop.f32.mrb[15].mxu1  ;;  %v903_v53 = vadd.f32 %v902_v47, %v899_v49  ;;  %v1656_v47 = vld [vmem:[#allocation8] sm:$0xff]  }
 0x333   : > { %1492 = vmatpush3.bf16.msra.mxu1 %v1656_v47 }
 0x334   : > { %v904_v54 = vsel %vm486_vm2, %v903_v53, -inf  ;;  %1493 = vmatprep.subr.bf16.mxu1 %v2002_v0 }
 0x335   : > { %905 = vmax.xlane.f32.xlu1 %v904_v54 }
 0x337   : > { %1494 = vmatpush3.bf16.msra.mxu1 %v1657_v48 }
 0x338   : > { %1507 = vmatprep.subr.bf16.mxu1 %v2002_v0 }
 0x3aa   : > { %v539_v55 = vpop.xlane.xlu1 %538 }
 0x3ab   : > { %v540_v56 = vsub.f32 %v536_v28, %v539_v55 }
 0x3ad   : > { %v541_v57 = vmul.f32 1.442695, %v540_v56 }
 0x3af   : > { %1664 = vpow2.f32 %v541_v57 }
 0x3b2   : > { %v658_v58 = vpop.xlane.xlu0 %657 }
 0x3b3   : > { %v659_v59 = vsub.f32 %v655_v36, %v658_v58 }
 0x3b5   : > { %v660_v60 = vmul.f32 1.442695, %v659_v59 }
 0x3b7   : > { %1666 = vpow2.f32 %v660_v60 }
 0x3b9   : > { %v1665_v61 = vpop.eup %1664 }
 0x3ba   : > { %v782_v62 = vpop.xlane.xlu0 %781  ;;  %v543_v63 = vsel %vm486_vm2, %v1665_v61, 0.0 }
 0x3bb   : > { %v783_v1 = vsub.f32 %v779_v45, %v782_v62  ;;  %544 = vadd.xlane.f32.xlu0 %v543_v63  ;;  %v1658_v63 = vld [vmem:[#allocation11] sm:$0xff]  }
 0x3bd   : > { %v784_v2 = vmul.f32 1.442695, %v783_v1  ;;  %v1659_v1 = vld [vmem:[#allocation11 + $0x8] sm:$0xff]  }
 0x3bf   : > { %1668 = vpow2.f32 %v784_v2 }
 0x3c1   : > { %v1667_v4 = vpop.eup %1666 }
 0x3c2   : > { %v662_v5 = vsel %vm486_vm2, %v1667_v4, 0.0  ;;  %v906_v9 = vpop.xlane.xlu1 %905 }
 0x3c3   : > { %663 = vadd.xlane.f32.xlu1 %v662_v5  ;;  %v907_v10 = vsub.f32 %v903_v53, %v906_v9 }
 0x3c5   : > { %v908_v11 = vmul.f32 1.442695, %v907_v10 }
 0x3c7   : > { %1670 = vpow2.f32 %v908_v11  ;;  %v1660_v11 = vld [vmem:[#allocation14] sm:$0xff]  }
 0x3c9   : > { %v1669_v7 = vpop.eup %1668 }
 0x3ca   : > { %v786_v8 = vsel %vm486_vm2, %v1669_v7, 0.0 }
 0x3cb   : > { %787 = vadd.xlane.f32.xlu0 %v786_v8 }
 0x3d1   : > { %v1671_v12 = vpop.eup %1670 }
 0x3d2   : > { %v910_v13 = vsel %vm486_vm2, %v1671_v12, 0.0 }
 0x3d4   : > { %668 = vrot.lane.b32.xlu1 %v2385_v6, %s2011_s13  ;;  %s2464_s13 = scalar_lea.hbm %s2517_s8, %s1399_s20 }
 0x3e1   : > { %549 = vrot.lane.b32.xlu0 %v2385_v6, %s2012_s1  ;;  %s1199_s1 = scalar_lea.sflag [#allocation5], %s2344_s22 }
 0x3e5   : > { %916 = vrot.lane.b32.xlu0 %v2385_v6, %s2013_s14  ;;  %s1912_s14 = sshll.u32 %s2018_s10, 4  ;;  %s1913_s14 = int_to_ptr.vmem [resolvable:$false] %s1912_s14 }
 0x3e6   : > { %p1915_p2 = scmp.lt.s32.totalorder %s2466_s21, %s1913_s14 }
 0x3f8   : > { %911 = vadd.xlane.f32.xlu1 %v910_v13  ;;  %v1662_v13 = vld [vmem:[#allocation14 + $0x10] sm:$0xff]  }
 0x409   : > { %792 = vrot.lane.b32.xlu1 %v2385_v6, %s2014_s16  ;;  %s1914_s16 = scalar_lea.vmem %s1913_s14, 256 }
 0x40a   : > { %p1916_p3 = scmp.lt.s32.totalorder %s1914_s16, %s1908_s11 }
 0x40c   : > { %p1917_p6 = por %p1916_p3, %p1915_p2 }
 0x40e   : > { %p1918_p10 = pnand %p1917_p6, %p1911_p0 }
 0x448   : > { %v545_v14 = vpop.xlane.xlu0 %544 }
 0x449   : > { %1672 = vrcp.f32 %v545_v14  ;;  %v1663_v14 = vld [vmem:[#allocation14 + $0x18] sm:$0xff]  }
 0x450   : > { %v664_v15 = vpop.xlane.xlu1 %663 }
 0x451   : > { %1674 = vrcp.f32 %v664_v15  ;;  %v1388_v15 = vld [vmem:[#allocation12] ss:$0 sm:$0xff] }
 0x453   : > { %v1673_v16 = vpop.eup %1672 }
 0x454   : > { %v547_v18 = vmul.f32 %v1673_v16, %v1665_v61  ;;  %v669_v21 = vpop.permute.xlu1 %668 }
 0x455   : > { %v674_v24 = vsel %vm554_vm3, %v669_v21, 0 }
 0x456   : > { %v548_v22 = vpack.c.bf16 %v547_v18, %v547_v18 }
 0x458   : > { %v788_v17 = vpop.xlane.xlu0 %787 }
 0x459   : > { %1676 = vrcp.f32 %v788_v17 }
 0x45b   : > { %v1675_v23 = vpop.eup %1674 }
 0x45c   : > { %v550_v19 = vpop.permute.xlu0 %549  ;;  %v666_v6 = vmul.f32 %v1675_v23, %v1667_v4 }
 0x45d   : > { %v556_v20 = vsel %vm554_vm3, %v550_v19, 0 }
 0x45e   : > { %1450 = vmatpush3.bf16.msra.mxu0 %v556_v20  ;;  %v667_v25 = vpack.c.bf16 %v666_v6, %v666_v6 }
 0x45f   : > { %1461 = vmatprep.subr.bf16.mxu0 %v2002_v0 }
 0x460   : > { %v917_v31 = vpop.permute.xlu0 %916 }
 0x461   : > { %1452 = vmatmul.mubr.msk.bf16.vlgmr.msra.gmra.mrb[4].mxu0 %vm486_vm2, %v548_v22  ;;  %v922_v33 = vsel %vm554_vm3, %v917_v31, 0 }
 0x462   : > { %1462 = vmatpush3.bf16.msra.mxu0 %v674_v24  ;;  %1463 = vmatprep.mubr.msk.bf16.mxu0 %vm2003_vm0, %v2002_v0 }
 0x463   : > { %1473 = vmatprep.subr.bf16.mxu0 %v2002_v0  ;;  %v1677_v26 = vpop.eup %1676 }
 0x464   : > { %v790_v28 = vmul.f32 %v1677_v26, %v1669_v7 }
 0x466   : > { %v791_v32 = vpack.c.bf16 %v790_v28, %v790_v28  ;;  %v1392_v28 = vld [vmem:[#allocation15] ss:$0 sm:$0xff] }
 0x469   : > { %1464 = vmatmul.mubr.msk.bf16.vlgmr.msra.gmra.mrb[8].mxu0 %vm486_vm2, %v667_v25 }
 0x46a   : > { %1475 = vmatprep.mubr.msk.bf16.mxu0 %vm2003_vm0, %v2002_v0 }
 0x485   : > { %v912_v27 = vpop.xlane.xlu1 %911 }
 0x486   : > { %1678 = vrcp.f32 %v912_v27 }
 0x489   : > { %v793_v29 = vpop.permute.xlu1 %792 }
 0x48a   : > { %v798_v30 = vsel %vm554_vm3, %v793_v29, 0 }
 0x48b   : > { %1474 = vmatpush3.bf16.msra.mxu0 %v798_v30 }
 0x48c   : > { %1485 = vmatprep.subr.bf16.mxu0 %v2002_v0 }
 0x48e   : > { %1476 = vmatmul.mubr.msk.bf16.vlgmr.msra.gmra.mrb[12].mxu0 %vm486_vm2, %v791_v32 }
 0x48f   : > { %1486 = vmatpush3.bf16.msra.mxu0 %v922_v33  ;;  %1487 = vmatprep.mubr.msk.bf16.mxu0 %vm2003_vm0, %v2002_v0 }
 0x490   : > { %v1679_v34 = vpop.eup %1678  ;;  %1499 = vmatprep.subr.bf16.mxu0 %v2002_v0 }
 0x491   : > { %v914_v35 = vmul.f32 %v1679_v34, %v1671_v12  ;;  %v1661_v12 = vld [vmem:[#allocation14 + $0x8] sm:$0xff]  }
 0x493   : > { %v915_v36 = vpack.c.bf16 %v914_v35, %v914_v35 }
 0x496   : > { %1488 = vmatmul.mubr.msk.bf16.vlgmr.msra.gmra.mrb[16].mxu0 %vm486_vm2, %v915_v36 }
 0x497   : > { %1503 = vmatprep.mubr.msk.bf16.mxu0 %vm2003_vm0, %v2002_v0  ;;  %1500 = vmatpush3.bf16.msra.mxu0 %v1658_v63 }
 0x498   : > { %1501 = vmatprep.subr.bf16.mxu0 %v2002_v0 }
 0x49b   : > { %1502 = vmatpush3.bf16.msra.mxu0 %v1659_v1 }
 0x534   : > { %v592_v37 = vpop.f32.mrb[4].mxu0 }
 0x535   : > { %v598_v38 = vpack.c.bf16 %v592_v37, %v592_v37  ;;  %v1453_v39 = vpop.f32.mrb[5].mxu0 }
 0x536   : > { %v595_v40 = vpop.f32.mrb[6].mxu0 }
 0x537   : > { %600 = vst.msk [vmem:[#allocation2] sm:$0xf] %vm599_vm4, %v598_v38  ;;  %v1454_v41 = vpop.f32.mrb[7].mxu0 }
 0x53c   : > { %v710_v42 = vpop.f32.mrb[8].mxu0 }
 0x53d   : > { %v1402_v43 = vpack.c.bf16 %v710_v42, %v710_v42  ;;  %v1465_v44 = vpop.f32.mrb[9].mxu0 }
 0x53e   : > { %v713_v45 = vpop.f32.mrb[10].mxu0 }
 0x53f   : > { %720 = vrot.lane.b32.xlu1 %v1402_v43, %s2015_s17  ;;  %v1466_v46 = vpop.f32.mrb[11].mxu0 }
 0x561   : > { %v834_v49 = vpop.f32.mrb[12].mxu0 }
 0x562   : > { %v1403_v50 = vpack.c.bf16 %v834_v49, %v834_v49  ;;  %v1477_v51 = vpop.f32.mrb[13].mxu0 }
 0x563   : > { %v837_v52 = vpop.f32.mrb[14].mxu0 }
 0x564   : > { %844 = vrot.lane.b32.xlu0 %v1403_v50, %s2016_s12  ;;  %v1478_v53 = vpop.f32.mrb[15].mxu0 }
 0x569   : > { %v958_v54 = vpop.f32.mrb[16].mxu0 }
 0x56a   : > { %v1404_v55 = vpack.c.bf16 %v958_v54, %v958_v54  ;;  %v1489_v56 = vpop.f32.mrb[17].mxu0 }
 0x56b   : > { %v961_v57 = vpop.f32.mrb[18].mxu0 }
 0x56c   : > { %968 = vrot.lane.b32.xlu1 %v1404_v55, %s2017_s19  ;;  %v1490_v58 = vpop.f32.mrb[19].mxu0 }
 0x5b1   : > { %v721_v59 = vpop.permute.xlu1 %720 }
 0x5b2   : > { %724 = vst.msk [vmem:[#allocation2] sm:$0xf] %vm723_vm5, %v721_v59 }
 0x5d6   : > { %v845_v60 = vpop.permute.xlu0 %844 }
 0x5d7   : > { %848 = vst.msk [vmem:[#allocation2] sm:$0xf] %vm847_vm6, %v845_v60 }
 0x5de   : > { %v969_v61 = vpop.permute.xlu1 %968 }
 0x5df   : > { %972 = vst.msk [vmem:[#allocation2] sm:$0xf] %vm971_vm7, %v969_v61 }
 0x5e6   : > { %v973_v62 = vld [vmem:[#allocation2] sm:$0xf] }
 0x5e7   : > { %1496 = vmatmul.mubr.msk.bf16.vlgmr.msra.gmra.mrb[16].mxu1 %vm438_vm1, %v973_v62 }
 0x5e8   : > { %1515 = vmatprep.mubr.msk.bf16.mxu1 %vm2003_vm0, %v2002_v0  ;;  %1508 = vmatpush3.bf16.msra.mxu1 %v1660_v11 }
 0x5e9   : > { %1509 = vmatprep.subr.bf16.mxu1 %v2002_v0 }
 0x5ec   : > { %1510 = vmatpush3.bf16.msra.mxu1 %v1661_v12 }
 0x5ed   : > { %1511 = vmatprep.subr.bf16.mxu1 %v2002_v0 }
 0x5f0   : > { %1512 = vmatpush3.bf16.msra.mxu1 %v1662_v13 }
 0x5f1   : > { %1513 = vmatprep.subr.bf16.mxu1 %v2002_v0 }
 0x5f4   : > { %1514 = vmatpush3.bf16.msra.mxu1 %v1663_v14 }
 0x6ba   : > { %v1027_v2 = vpop.f32.mrb[16].mxu1 }
 0x6bb   : > { %v1033_v4 = vsub.f32 1.0, %v1027_v2  ;;  %v1497_v5 = vpop.f32.mrb[17].mxu1 }
 0x6bc   : > { %v1030_v7 = vpop.f32.mrb[18].mxu1 }
 0x6bd   : > { %v1034_v8 = vmul.f32 %v1033_v4, %v2376_v3  ;;  %v1498_v9 = vpop.f32.mrb[19].mxu1 }
 0x6bf   : > { %v1035_v10 = vpack.c.bf16 %v1034_v8, %v1034_v8 }
 0x6c1   : > { %1504 = vmatmul.mubr.msk.bf16.vlgmr.msra.gmra.mrb[20].mxu0 %vm438_vm1, %v1035_v10 }
 0x794   : > { %v1096_v3 = vpop.f32.mrb[20].mxu0 }
 0x795   : > { %v1097_v16 = vadd.f32 %v1388_v15, %v1096_v3  ;;  %v1505_v17 = vpop.f32.mrb[21].mxu0 }
 0x796   : > { %v1099_v18 = vpop.f32.mrb[22].mxu0 }
 0x797   : > { %v1102_v19 = vmul.f32 %v1097_v16, %v1097_v16  ;;  %v1506_v20 = vpop.f32.mrb[23].mxu0 }
 0x799   : > { %v1103_v21 = vmul.f32 %v1102_v19, %v1097_v16 }
 0x79b   : > { %v1104_v22 = vmul.f32 0.044715, %v1103_v21 }
 0x79d   : > { %v1105_v23 = vadd.f32 %v1104_v22, %v1097_v16 }
 0x79f   : > { %v1106_v24 = vmul.f32 0.7978846, %v1105_v23 }
 0x7a1   : > { %1680 = vtanh.f32 %v1106_v24 }
 0x7ab   : > { %v1681_v6 = vpop.eup %1680 }
 0x7ac   : > { %v1108_v25 = vadd.f32 1.0, %v1681_v6 }
 0x7ae   : > { %v1109_v26 = vmul.f32 0.5, %v1108_v25 }
 0x7b0   : > { %v1110_v0 = vmul.f32 %v1109_v26, %v1097_v16 }
 0x7b2   : > { %v1111_v27 = vpack.c.bf16 %v1110_v0, %v1110_v0 }
 0x7b4   : > { %1516 = vmatmul.mubr.msk.bf16.vlgmr.msra.gmra.mrb[20].mxu1 %vm1151_vm8, %v1111_v27 }
 0x887   : > { %v1189_v29 = vpop.f32.mrb[20].mxu1 }
 0x888   : > { %v1190_v30 = vadd.f32 %v1392_v28, %v1189_v29  ;;  %v1517_v31 = vpop.f32.mrb[21].mxu1 }
 0x889   : > { %v1192_v32 = vpop.f32.mrb[22].mxu1 }
 0x88a   : > { %v1195_v33 = vsub.f32 1.0, %v1190_v30  ;;  %v1518_v34 = vpop.f32.mrb[23].mxu1 }
 0x88c   : > { %v1196_v35 = vmul.f32 %v1195_v33, %v1034_v8 }
 0x88e   : > { %1197 = vst.msk [vmem:[%s418_s18] sm:$0xff] %vm438_vm1, %v1196_v35 }
 0x88f   : > { %1921 = shalt.err (!%p1918_p10)
}
 0x890   : > { %s1922_s22 = scalar_lea.hbm %s2464_s13, 128  ;;  %s1926_s19 = scalar_lea.hbm %s2517_s8, 256 }
 0x891   : > { %p1923_p11 = scmp.ne.s32.totalorder %s2464_s13, %s1922_s22  ;;  %p1927_p9 = scmp.lt.u32.totalorder %s2464_s13, %s2517_s8 }
 0x892   : > { %p1928_p7 = scmp.lt.u32.totalorder %s1926_s19, %s1922_s22  ;;  %p1930_p12 = scmp.lt.u32.totalorder %s1922_s22, %s2464_s13 }
 0x893   : > { %p1924_p8 = pnand %p1923_p11, %p2543_p1 }
 0x894   : > { %p1929_p4 = por %p1928_p7, %p1927_p9 }
 0x895   : > { %p1925_p5 = pneg %p1924_p8 }
 0x896   : > { %p1931_p13 = por %p1930_p12, %p1929_p4 }
 0x898   : > { %p1932_p0 = pnand %p1931_p13, %p1925_p5 }
 0x89a   : > { %1935 = shalt.err (!%p1932_p0)
}
 0x89b   : > { %1549 = dma.vmem_to_hbm [thread:$0]  (%p2543_p1), %s2466_s21, 128, %s2464_s13, %s1199_s1  }
 0x89c PF: > { %s1224_s23 = sand.u32 1, %s1978_s27   ;;  %p2544_p2 = scmp.ne.s32.totalorder %s2532_s26, 0 }
 0x89d   : > { %p2545_p3 = scmp.ge.s32.totalorder %s1990_s30, 2  ;;  %s1225_s24 = scalar_lea.sflag [#allocation5], %s1224_s23 }
 0x89f   : > { %p1578_p6 = pnand %p2545_p3, %p2544_p2 }
 0x8a1   : > { %1973 = dma.done.wait (!%p1578_p6), %s1225_s24, 128  }
 0x8a2   : > { %1975 = vsyncadd (!%p1578_p6), %s1225_s24, 4294967168  ;;  %p25_p10 = scmp.ge.s32.totalorder %s2274_s15, 4   ;;  %s2546_s27 = smov %s1982_s28 }
 0x8a3   : > { %s2547_s28 = smov %s1986_s29  ;;  %s2548_s29 = smov %s2286_s9 }
 0x8a4   : > { %s2549_s30 = smov %s2274_s15  ;;  %27 = sbr.rel (!%p25_p10) target bundleno = 11 (0xb), region = 128 }
 0x8ab   :  { %1230 = vsyncpa [#allocation4], 1 }
 0x8ac   :  { %1232 = vsyncpa [#allocation4 + $0x1], 1 }
 0x8ad   :  { %1233 = vsyncpa [#allocation7], 1 }
 0x8ae   :  { %1234 = vsyncpa [#allocation10], 1 }
 0x8af   :  { %1235 = vsyncpa [#allocation13], 1 }
 0x8b0   :  { %1236 = vsyncpa [#allocation16], 1 }
 0x8b1   :  { %1237 = vsyncpa [#allocation5], 1 }
 0x8b2   :  { %1239 = vsyncpa [#allocation5 + $0x1], 1 }

// kernel: tpu_custom_call.1
= control target key start
LH: loop header
LB: loop body
LE: loop exit
PB: predicated region body
PF: predicated region fallthrough
CT: control target
= control target key end

     0   :  { %s2509_s0 = inlined_call_operand.hbm [shape: f32[2,8,32], index: 0, kind: input, shape index: {}]   ;;  %s2510_s1 = inlined_call_operand.hbm [shape: bf16[32,96], index: 1, kind: input, shape index: {}]   ;;  %s2511_s2 = inlined_call_operand.hbm [shape: bf16[32,32], index: 2, kind: input, shape index: {}]   ;;  %s2512_s3 = inlined_call_operand.hbm [shape: bf16[4,8,8], index: 3, kind: input, shape index: {}]   ;;  %s2513_s4 = inlined_call_operand.hbm [shape: bf16[32,64], index: 4, kind: input, shape index: {}]   ;;  %s2514_s5 = inlined_call_operand.hbm [shape: f32[1,64], index: 5, kind: input, shape index: {}]   ;;  %s2515_s6 = inlined_call_operand.hbm [shape: bf16[64,32], index: 6, kind: input, shape index: {}]   ;;  %s2516_s7 = inlined_call_operand.hbm [shape: f32[1,32], index: 7, kind: input, shape index: {}]   ;;  %s2517_s8 = inlined_call_operand.hbm [shape: f32[2,8,32], index: 8, kind: output, shape index: {}]  }
   0x1   :  { %2523 = sst [smem:[#allocation24_spill]] %s2510_s1 }
   0x2   :  { %13 = vsyncpa [#allocation4], 0 }
   0x3   :  { %15 = vsyncpa [#allocation4 + $0x1], 0 }
   0x4   :  { %16 = vsyncpa [#allocation7], 0 }
   0x5   :  { %17 = vsyncpa [#allocation10], 0 }
   0x6   :  { %18 = vsyncpa [#allocation13], 0 }
   0x7   :  { %19 = vsyncpa [#allocation16], 0 }
   0x8   :  { %20 = vsyncpa [#allocation5], 0 }
   0x9   :  { %22 = vsyncpa [#allocation5 + $0x1], 0  ;;  %s2064_s27 = smov 0   ;;  %s2066_s28 = smov 0  }
   0xa   :  { %s2068_s29 = smov 0   ;;  %s2070_s30 = smov 0  }
   0xb LB: > { %s1992_s9 = smov [#allocation6]   ;;  %s2085_s11 = sadd.s32 4294967295, %s1990_s30   ;;  %s1990_s30 = sphi %s2070_s30, %s2549_s30   ;;  %s1986_s29 = sphi %s2068_s29, %s2548_s29   ;;  %s1982_s28 = sphi %s2066_s28, %s2547_s28   ;;  %s1978_s27 = sphi %s2064_s27, %s2546_s27  }
   0xc   : > { %s244_s10 = sshll.u32 %s1992_s9, 4  ;;  %p1350_p0 = scmp.ge.s32.totalorder %s1990_s30, 1  ;;  %s2090_s10 = int_to_ptr.vmem [resolvable:$true] %s244_s10 }
   0xd   : > { %p2520_p1 = scmp.eq.s32.totalorder %s2085_s11, 0  ;;  %p232_p2 = scmp.lt.s32.totalorder %s1990_s30, 3 }
   0xe   : > { %s1993_s13 = smov [#allocation9]   ;;  %s1994_s16 = smov [#allocation12]  }
   0xf   : > { %p2092_p3 = pnand %p1350_p0, %p232_p2  ;;  %s270_s14 = sshll.u32 %s1993_s13, 4  ;;  %s2105_s14 = int_to_ptr.vmem [resolvable:$true] %s270_s14 }
  0x10   : > { %s297_s17 = sshll.u32 %s1994_s16, 4  ;;  %s2526_s1 = sld [smem:[#allocation24_spill]]  ;;  %s2107_s17 = int_to_ptr.vmem [resolvable:$true] %s297_s17 }
  0x11   : > { %s2524_s12 = scalar_select %p2092_p3, 1, 0 }
  0x12   : > { %p1551_p5 = pneg %p2092_p3 }
  0x14   : > { %p2101_p6 = pnand %p1551_p5, %p2520_p1 }
  0x16   : > { %s1682_s20 = scalar_lea.hbm %s2526_s1, 256  ;;  %p2117_p8 = pneg %p2101_p6 }
  0x17   : > { %p1683_p7 = scmp.ne.s32.totalorder %s2526_s1, %s1682_s20  ;;  %p1689_p11 = scmp.lt.u32.totalorder %s1682_s20, %s2526_s1 }
  0x19   : > { %p1685_p9 = pnand %p2117_p8, %p1683_p7 }
  0x1b   : > { %p1686_p10 = pneg %p1685_p9 }
  0x1d   : > { %p1691_p12 = pnand %p1689_p11, %p1686_p10 }
  0x1f   : > { %1694 = shalt.err (!%p1691_p12)
}
  0x20   : > { %s1695_s26 = scalar_lea.vmem %s2090_s10, 256  ;;  %p1703_p5 = scmp.lt.s32.totalorder %s2090_s10, %s2090_s10 }
  0x21   : > { %p1696_p13 = scmp.ne.s32.totalorder %s2090_s10, %s1695_s26  ;;  %p1704_p4 = scmp.lt.s32.totalorder %s1695_s26, %s1695_s26 }
  0x23   : > { %p1698_p0 = pnand %p1696_p13, %p2117_p8  ;;  %p1705_p7 = por %p1704_p4, %p1703_p5 }
  0x25   : > { %p1699_p2 = pneg %p1698_p0 }
  0x27   : > { %p1706_p9 = pnand %p1705_p7, %p1699_p2 }
  0x29   : > { %1709 = shalt.err (!%p1706_p9)
}
  0x2a   : > { %s2518_s9 = smov 64   ;;  %s1996_s13 = smov 4  }
  0x2b   : > { %1554 = dma.hbm_to_vmem [thread:$0]  (!%p2101_p6), %s2526_s1, 256, %s2090_s10, [#allocation7], %s2518_s9, %s2518_s9, %s1996_s13  }
  0x2c   : > { %s1710_s21 = scalar_lea.hbm %s2512_s3, 256 }
  0x2d   : > { %p1711_p4 = scmp.ne.s32.totalorder %s2512_s3, %s1710_s21  ;;  %p1717_p12 = scmp.lt.u32.totalorder %s1710_s21, %s2512_s3 }
  0x2f   : > { %p1713_p10 = pnand %p1711_p4, %p2117_p8 }
  0x31   : > { %p1714_p11 = pneg %p1713_p10 }
  0x33   : > { %p1719_p13 = pnand %p1717_p12, %p1714_p11 }
  0x35   : > { %1722 = shalt.err (!%p1719_p13)
}
  0x36   : > { %s1723_s10 = scalar_lea.vmem %s2105_s14, 256  ;;  %p1731_p7 = scmp.lt.s32.totalorder %s2105_s14, %s2105_s14 }
  0x37   : > { %p1724_p0 = scmp.ne.s32.totalorder %s2105_s14, %s1723_s10  ;;  %p1732_p9 = scmp.lt.s32.totalorder %s1723_s10, %s1723_s10 }
  0x39   : > { %p1726_p2 = pnand %p1724_p0, %p2117_p8  ;;  %p1733_p4 = por %p1732_p9, %p1731_p7 }
  0x3b   : > { %p1727_p5 = pneg %p1726_p2 }
  0x3d   : > { %p1734_p10 = pnand %p1733_p4, %p1727_p5 }
  0x3f   : > { %1737 = shalt.err (!%p1734_p10)
}
  0x40   : > { %1560 = dma.hbm_to_vmem [thread:$0]  (!%p2101_p6), %s2512_s3, 256, %s2105_s14, [#allocation10], %s2518_s9, %s2518_s9, %s1996_s13  }
  0x41   : > { %s1738_s21 = scalar_lea.hbm %s2514_s5, 16 }
  0x42   : > { %p1739_p11 = scmp.ne.s32.totalorder %s2514_s5, %s1738_s21  ;;  %p1745_p0 = scmp.lt.u32.totalorder %s1738_s21, %s2514_s5 }
  0x44   : > { %p1741_p12 = pnand %p1739_p11, %p2117_p8 }
  0x46   : > { %p1742_p13 = pneg %p1741_p12 }
  0x48   : > { %p1747_p2 = pnand %p1745_p0, %p1742_p13 }
  0x4a   : > { %1750 = shalt.err (!%p1747_p2)
}
  0x4b   : > { %s1751_s14 = scalar_lea.vmem %s2107_s17, 16  ;;  %s1758_s10 = scalar_lea.vmem %s2107_s17, 32 }
  0x4c   : > { %p1752_p5 = scmp.ne.s32.totalorder %s2107_s17, %s1751_s14  ;;  %p1759_p4 = scmp.lt.s32.totalorder %s2107_s17, %s2107_s17 }
  0x4d   : > { %p1760_p10 = scmp.lt.s32.totalorder %s1758_s10, %s1751_s14 }
  0x4e   : > { %p1754_p7 = pnand %p1752_p5, %p2117_p8 }
  0x4f   : > { %p1761_p11 = por %p1760_p10, %p1759_p4 }
  0x50   : > { %p1755_p9 = pneg %p1754_p7 }
  0x52   : > { %p1762_p12 = pnand %p1761_p11, %p1755_p9 }
  0x54   : > { %1765 = shalt.err (!%p1762_p12)
}
  0x55   : > { %1566 = dma.hbm_to_vmem [thread:$0]  (!%p2101_p6), %s2514_s5, 16, %s2107_s17, [#allocation13]  }
  0x56   : > { %s1997_s19 = smov [#allocation8]   ;;  %s1998_s21 = smov [#allocation11]  }
  0x57   : > { %s257_s20 = sshll.u32 %s1997_s19, 4  ;;  %s283_s22 = sshll.u32 %s1998_s21, 4  ;;  %s258_s20 = int_to_ptr.vmem [resolvable:$true] %s257_s20  ;;  %s284_s22 = int_to_ptr.vmem [resolvable:$true] %s283_s22 }
  0x58   : > { %s1766_s26 = scalar_lea.hbm %s2511_s2, 256 }
  0x59   : > { %p1767_p13 = scmp.ne.s32.totalorder %s2511_s2, %s1766_s26  ;;  %p1773_p5 = scmp.lt.u32.totalorder %s1766_s26, %s2511_s2 }
  0x5b   : > { %p1769_p0 = pnand %p1767_p13, %p2117_p8 }
  0x5d   : > { %p1770_p2 = pneg %p1769_p0 }
  0x5f   : > { %p1775_p7 = pnand %p1773_p5, %p1770_p2 }
  0x61   : > { %1778 = shalt.err (!%p1775_p7)
}
  0x62   : > { %s1779_s17 = scalar_lea.vmem %s258_s20, 256  ;;  %p1787_p11 = scmp.lt.s32.totalorder %s258_s20, %s258_s20 }
  0x63   : > { %p1780_p9 = scmp.ne.s32.totalorder %s258_s20, %s1779_s17  ;;  %p1788_p12 = scmp.lt.s32.totalorder %s1779_s17, %s1779_s17 }
  0x65   : > { %p1782_p4 = pnand %p1780_p9, %p2117_p8  ;;  %p1789_p1 = por %p1788_p12, %p1787_p11 }
  0x67   : > { %p1783_p10 = pneg %p1782_p4 }
  0x69   : > { %p1790_p3 = pnand %p1789_p1, %p1783_p10 }
  0x6b   : > { %1793 = shalt.err (!%p1790_p3)
}
  0x6c   : > { %s2528_s18 = smov 64   ;;  %s1794_s25 = scalar_lea.hbm %s2513_s4, 256 }
  0x6d   : > { %1557 = dma.hbm_to_vmem [thread:$0]  (!%p2101_p6), %s2511_s2, 256, %s258_s20, [#allocation7], %s2528_s18, %s2528_s18, %s1996_s13  }
  0x6e   : > { %p1795_p1 = scmp.ne.s32.totalorder %s2513_s4, %s1794_s25  ;;  %p1801_p0 = scmp.lt.u32.totalorder %s1794_s25, %s2513_s4 }
  0x70   : > { %p1797_p3 = pnand %p1795_p1, %p2117_p8 }
  0x72   : > { %p1798_p13 = pneg %p1797_p3 }
  0x74   : > { %p1803_p2 = pnand %p1801_p0, %p1798_p13 }
  0x76   : > { %1806 = shalt.err (!%p1803_p2)
}
  0x77   : > { %s1807_s17 = scalar_lea.vmem %s284_s22, 256  ;;  %p1815_p4 = scmp.lt.s32.totalorder %s284_s22, %s284_s22 }
  0x78   : > { %p1808_p5 = scmp.ne.s32.totalorder %s284_s22, %s1807_s17  ;;  %p1816_p10 = scmp.lt.s32.totalorder %s1807_s17, %s1807_s17 }
  0x7a   : > { %p1810_p7 = pnand %p1808_p5, %p2117_p8  ;;  %p1817_p11 = por %p1816_p10, %p1815_p4 }
  0x7c   : > { %p1811_p9 = pneg %p1810_p7 }
  0x7e   : > { %p1818_p12 = pnand %p1817_p11, %p1811_p9 }
  0x80   : > { %1821 = shalt.err (!%p1818_p12)
}
  0x81   : > { %1563 = dma.hbm_to_vmem [thread:$0]  (!%p2101_p6), %s2513_s4, 256, %s284_s22, [#allocation10], %s2528_s18, %s2528_s18, %s1996_s13  }
  0x82   : > { %s1999_s19 = smov [#allocation14]   ;;  %s2000_s24 = smov [#allocation15]  }
  0x83   : > { %s307_s21 = sshll.u32 %s1999_s19, 4  ;;  %s321_s25 = sshll.u32 %s2000_s24, 4  ;;  %s308_s21 = int_to_ptr.vmem [resolvable:$true] %s307_s21  ;;  %s322_s25 = int_to_ptr.vmem [resolvable:$true] %s321_s25 }
  0x84   : > { %s1822_s10 = scalar_lea.hbm %s2515_s6, 512 }
  0x85   : > { %p1823_p1 = scmp.ne.s32.totalorder %s2515_s6, %s1822_s10  ;;  %p1829_p0 = scmp.lt.u32.totalorder %s1822_s10, %s2515_s6 }
  0x87   : > { %p1825_p3 = pnand %p1823_p1, %p2117_p8 }
  0x89   : > { %p1826_p13 = pneg %p1825_p3 }
  0x8b   : > { %p1831_p2 = pnand %p1829_p0, %p1826_p13 }
  0x8d   : > { %1834 = shalt.err (!%p1831_p2)
}
  0x8e   : > { %s1835_s22 = scalar_lea.vmem %s308_s21, 512  ;;  %p1843_p4 = scmp.lt.s32.totalorder %s308_s21, %s308_s21 }
  0x8f   : > { %p1836_p5 = scmp.ne.s32.totalorder %s308_s21, %s1835_s22  ;;  %p1844_p10 = scmp.lt.s32.totalorder %s1835_s22, %s1835_s22 }
  0x91   : > { %p1838_p7 = pnand %p1836_p5, %p2117_p8  ;;  %p1845_p11 = por %p1844_p10, %p1843_p4 }
  0x93   : > { %p1839_p9 = pneg %p1838_p7 }
  0x95   : > { %p1846_p12 = pnand %p1845_p11, %p1839_p9 }
  0x97   : > { %1849 = shalt.err (!%p1846_p12)
}
  0x98   : > { %1569 = dma.hbm_to_vmem [thread:$0]  (!%p2101_p6), %s2515_s6, 512, %s308_s21, [#allocation13], %s2528_s18, %s2528_s18, %s1996_s13  }
  0x99   : > { %s1850_s26 = scalar_lea.hbm %s2516_s7, 16 }
  0x9a   : > { %p1851_p1 = scmp.ne.s32.totalorder %s2516_s7, %s1850_s26  ;;  %p1857_p0 = scmp.lt.u32.totalorder %s1850_s26, %s2516_s7 }
  0x9c   : > { %p1853_p3 = pnand %p1851_p1, %p2117_p8 }
  0x9e   : > { %p1854_p13 = pneg %p1853_p3 }
  0xa0   : > { %p1859_p2 = pnand %p1857_p0, %p1854_p13 }
  0xa2   : > { %1862 = shalt.err (!%p1859_p2)
}
  0xa3   : > { %s1863_s20 = scalar_lea.vmem %s322_s25, 16  ;;  %s1870_s13 = scalar_lea.vmem %s322_s25, 32 }
  0xa4   : > { %p1864_p5 = scmp.ne.s32.totalorder %s322_s25, %s1863_s20  ;;  %p1871_p4 = scmp.lt.s32.totalorder %s322_s25, %s322_s25 }
  0xa5   : > { %p1872_p10 = scmp.lt.s32.totalorder %s1870_s13, %s1863_s20 }
  0xa6   : > { %p1866_p7 = pnand %p1864_p5, %p2117_p8 }
  0xa7   : > { %p1873_p11 = por %p1872_p10, %p1871_p4 }
  0xa8   : > { %p1867_p9 = pneg %p1866_p7 }
  0xaa   : > { %p1874_p12 = pnand %p1873_p11, %p1867_p9 }
  0xac   : > { %1877 = shalt.err (!%p1874_p12)
}
  0xad   : > { %1572 = dma.hbm_to_vmem [thread:$0]  (!%p2101_p6), %s2516_s7, 16, %s322_s25, [#allocation16]  }
  0xae   : > { %s1349_s23 = sadd.s32 4294967294, %s1990_s30   ;;  %s2274_s15 = sadd.s32 1, %s1990_s30  }
  0xaf   : > { %s35_s22 = sadd.s32 1, %s1986_s29  ;;  %s32_s1 = ssub.s32 %s1990_s30, %s2274_s15 }
  0xb0   : > { %p42_p8 = scmp.ne.s32.totalorder %s1986_s29, %s1982_s28  ;;  %p33_p1 = scmp.eq.s32.totalorder %s32_s1, 0 }
  0xb1   : > { %p43_p3 = scmp.eq.s32.totalorder %s1990_s30, 0  ;;  %p48_p13 = scmp.ne.s32.totalorder %s1982_s28, %s1978_s27 }
  0xb2   : > { %p219_p0 = scmp.eq.s32.totalorder %s2085_s11, 1  ;;  %p2529_p5 = scmp.eq.s32.totalorder %s2085_s11, 0 }
  0xb3   : > { %s2286_s9 = scalar_select %p33_p1, %s1986_s29, %s35_s22  }
  0xb4   : > { %p44_p2 = por %p43_p3, %p42_p8  ;;  %p2290_p7 = por %p2529_p5, %p48_p13 }
  0xb5   : > { %p2294_p6 = por %p219_p0, %p42_p8  ;;  %p225_p9 = scmp.eq.s32.totalorder %s1349_s23, 1 }
  0xb6   : > { %p1588_p4 = scmp.lt.s32.totalorder %s1990_s30, 2  ;;  %s332_s24 = sand.u32 1, %s1986_s29  }
  0xb7   : > { %s2531_s25 = scalar_select %p2294_p6, 1, 0 }
  0xb8   : > { %p2300_p10 = por %p225_p9, %p48_p13  ;;  %s1359_s14 = sshll.u32 %s332_s24, 3 }
  0xb9   : > { %s1360_s10 = sshll.u32 %s1990_s30, 7  ;;  %s336_s13 = scalar_lea.vmem [#allocation3], %s1359_s14 }
  0xba   : > { %s2532_s26 = scalar_select %p2300_p10, 1, 0 }
  0xbb   : > { %s2308_s20 = scalar_lea.hbm %s2509_s0, %s1360_s10  ;;  %s343_s18 = sshll.u32 %s336_s13, 4  ;;  %s2314_s18 = int_to_ptr.vmem [resolvable:$true] %s343_s18 }
  0xbc   : > { %p2310_p11 = pnand %p1588_p4, %p44_p2  ;;  %s333_s23 = scalar_lea.sflag [#allocation4], %s332_s24 }
  0xbd   : > { %s1878_s22 = scalar_lea.hbm %s2308_s20, 128  ;;  %s1883_s10 = scalar_lea.hbm %s2509_s0, 256 }
  0xbe   : > { %p1879_p12 = scmp.ne.s32.totalorder %s2308_s20, %s1878_s22  ;;  %p1880_p8 = pneg %p2310_p11 }
  0xbf   : > { %p1884_p13 = scmp.lt.u32.totalorder %s2308_s20, %s2509_s0  ;;  %p1885_p0 = scmp.lt.u32.totalorder %s1883_s10, %s1878_s22 }
  0xc0   : > { %p1881_p1 = pnand %p1880_p8, %p1879_p12  ;;  %p1887_p5 = scmp.lt.u32.totalorder %s1878_s22, %s2308_s20 }
  0xc1   : > { %p1886_p2 = por %p1885_p0, %p1884_p13 }
  0xc2   : > { %p1882_p3 = pneg %p1881_p1 }
  0xc3   : > { %p1888_p9 = por %p1887_p5, %p1886_p2 }
  0xc5   : > { %p1889_p4 = pnand %p1888_p9, %p1882_p3 }
  0xc7   : > { %1892 = shalt.err (!%p1889_p4)
}
  0xc8   : > { %s1893_s24 = scalar_lea.vmem %s2314_s18, 128  ;;  %s2001_s13 = smov [#allocation3]  }
  0xc9   : > { %p1894_p12 = scmp.ne.s32.totalorder %s2314_s18, %s1893_s24  ;;  %s1898_s1 = sshll.u32 %s2001_s13, 4  ;;  %s1899_s1 = int_to_ptr.vmem [resolvable:$false] %s1898_s1 }
  0xca   : > { %s1900_s14 = scalar_lea.vmem %s1899_s1, 256  ;;  %p1901_p6 = scmp.lt.s32.totalorder %s2314_s18, %s1899_s1 }
  0xcb   : > { %p1896_p1 = pnand %p1894_p12, %p1880_p8  ;;  %p1902_p13 = scmp.lt.s32.totalorder %s1900_s14, %s1893_s24 }
  0xcd   : > { %p1897_p10 = pneg %p1896_p1  ;;  %p1903_p0 = por %p1902_p13, %p1901_p6 }
  0xcf   : > { %p1904_p2 = pnand %p1903_p0, %p1897_p10 }
  0xd1   : > { %1907 = shalt.err (!%p1904_p2)
}
  0xd2   : > { %1576 = dma.hbm_to_vmem [thread:$0]  (!%p2310_p11), %s2308_s20, 128, %s2314_s18, %s333_s23  }
  0xd3   : > { %p2534_p3 = scmp.ne.s32.totalorder %s2524_s12, 0 }
  0xd4   : > { %s2344_s22 = sand.u32 (!%p2534_p3), 1, %s1982_s28  }
  0xd5   : > { %352 = sbr.rel (%p2534_p3) target bundleno = 2204 (0x89c), region = 52  ;;  %s1362_s10 = sshll.u32 (!%p2534_p3), %s2344_s22, 3 }
  0xd6   : > { %s355_s16 = scalar_lea.sflag (!%p2534_p3), [#allocation4], %s2344_s22  ;;  %s358_s17 = scalar_lea.vmem (!%p2534_p3), [#allocation3], %s1362_s10 }
  0xdc   : > { %1953 = dma.done.wait (%p2290_p7), %s355_s16, 128  }
  0xdd   : > { %1955 = vsyncadd (%p2290_p7), %s355_s16, 4294967168  ;;  %p2535_p6 = scmp.eq.s32.totalorder %s2085_s11, 0 }
  0xdf   : > { %1957 = dma.done.wait (%p2535_p6), [#allocation7], 512   ;;  %p2536_p10 = pmov %p2535_p6 }
  0xe0   : > { %p2537_p11 = pmov %p2535_p6 }
  0xe1   : > { %1959 = vsyncadd (%p2536_p10), [#allocation7], 4294966784 }
  0xe2   : > { %1961 = dma.done.wait (%p2537_p11), [#allocation10], 512   ;;  %p2538_p8 = pmov %p2535_p6 }
  0xe3   : > { %p2539_p5 = pmov %p2535_p6 }
  0xe4   : > { %1963 = vsyncadd (%p2538_p8), [#allocation10], 4294966784 }
  0xe5   : > { %1965 = dma.done.wait (%p2539_p5), [#allocation13], 528   ;;  %p2540_p9 = pmov %p2539_p5 }
  0xe6   : > { %p2541_p7 = pmov %p2539_p5 }
  0xe7   : > { %1967 = vsyncadd (%p2540_p9), [#allocation13], 4294966768 }
  0xe8   : > { %1969 = dma.done.wait (%p2541_p7), [#allocation16], 16   ;;  %p2542_p4 = pmov %p2539_p5 }
  0xe9   : > { %v2002_v0 = vmov 0.0   ;;  %vm2003_vm0 = vmmov 0   ;;  %v1654_v1 = vld [vmem:[#allocation6] sm:$0xff]   ;;  %v1655_v2 = vld [vmem:[#allocation6 + $0x8] sm:$0xff]   ;;  %v2376_v3 = vld [vmem:[%s358_s17] sm:$0xff]  ;;  %vm438_vm1 = vcmask 261120  }
  0xea   : > { %1971 = vsyncadd (%p2542_p4), [#allocation16], 4294967280  ;;  %1435 = vmatprep.subr.bf16.mxu0 %v2002_v0  ;;  %1439 = vmatprep.mubr.msk.bf16.mxu0 %vm2003_vm0, %v2002_v0  ;;  %v421_v4 = vpack.c.bf16 %v2376_v3, %v2376_v3  ;;  %s2004_s12 = smov 120   ;;  %s2005_s19 = smov 96   ;;  %vm486_vm2 = vcmask 64512   ;;  %v534_v21 = vld [vmem:[#allocation9] sm:$0xff]  }
  0xeb   : > { %1443 = vmatprep.subr.bf16.mxu1 %v2002_v0  ;;  %1445 = vmatprep.mubr.msk.bf16.mxu1 %vm2003_vm0, %v2002_v0  ;;  %s2006_s20 = smov 80   ;;  %s2007_s18 = smov 88   ;;  %v535_v22 = vunpack.c.l.bf16 %v534_v21  ;;  %v654_v30 = vunpack.c.h.bf16 %v534_v21  ;;  %v777_v37 = vld [vmem:[#allocation9 + $0x8] sm:$0xff]   ;;  %vm554_vm3 = vcmask 1043456   ;;  %vm599_vm4 = vcmask 60416  }
  0xec   : > { %1436 = vmatpush3.bf16.msra.mxu0 %v1654_v1  ;;  %s2008_s21 = smov 72   ;;  %s2009_s23 = smov 112   ;;  %v778_v39 = vunpack.c.l.bf16 %v777_v37  ;;  %v902_v47 = vunpack.c.h.bf16 %v777_v37  ;;  %vm723_vm5 = vcmask 126016   ;;  %vm847_vm6 = vcmask 191616  }
  0xed   : > { %1437 = vmatprep.subr.bf16.mxu0 %v2002_v0  ;;  %s2010_s24 = smov 104   ;;  %s2011_s13 = smov 56   ;;  %vm971_vm7 = vcmask 257216   ;;  %vm1151_vm8 = vcmask 523264  }
  0xee   : > { %s2012_s1 = smov 64   ;;  %s2013_s14 = smov 40  }
  0xef   : > { %s2014_s16 = smov 48   ;;  %s2015_s17 = smov 8  }
  0xf0   : > { %1438 = vmatpush3.bf16.msra.mxu0 %v1655_v2  ;;  %p2543_p1 = scmp.ne.s32.totalorder %s2531_s25, 0 }
  0xf1   : > { %1449 = vmatprep.subr.bf16.mxu0 %v2002_v0 }
  0xf3   : > { %1440 = vmatmul.mubr.msk.bf16.vlgmr.msra.gmra.mrb[0].mxu0 %vm438_vm1, %v421_v4 }
  0xf4   : > { %1451 = vmatprep.mubr.msk.bf16.mxu0 %vm2003_vm0, %v2002_v0 }
 0x1c6   : > { %v476_v5 = vpop.f32.mrb[0].mxu0 }
 0x1c7   : > { %v2385_v6 = vpack.c.bf16 %v476_v5, %v476_v5  ;;  %v1441_v7 = vpop.f32.mrb[1].mxu0 }
 0x1c8   : > { %v479_v8 = vpop.f32.mrb[2].mxu0 }
 0x1c9   : > { %601 = vrot.lane.b32.xlu1 %v2385_v6, %s2004_s12  ;;  %484 = vrot.lane.b32.xlu0 %v2385_v6, %s2005_s19  ;;  %v1442_v9 = vpop.f32.mrb[3].mxu0  ;;  %s2016_s12 = smov 16   ;;  %s2017_s19 = smov 24  }
 0x1cd   : > { %727 = vrot.lane.b32.xlu1 %v2385_v6, %s2006_s20  ;;  %603 = vrot.lane.b32.xlu0 %v2385_v6, %s2007_s18  ;;  %s1399_s20 = sshll.u32 %s2085_s11, 7  ;;  %s418_s18 = scalar_lea.vmem [#allocation17], %s1362_s10 }
 0x1ce   : > { %s2018_s10 = smov [#allocation17]  }
 0x1d1   : > { %851 = vrot.lane.b32.xlu1 %v2385_v6, %s2008_s21  ;;  %725 = vrot.lane.b32.xlu0 %v2385_v6, %s2009_s23  ;;  %s1212_s21 = sshll.u32 %s418_s18, 4  ;;  %s2466_s21 = int_to_ptr.vmem [resolvable:$true] %s1212_s21 }
 0x1d2   : > { %s1908_s11 = scalar_lea.vmem %s2466_s21, 128 }
 0x1d3   : > { %p1909_p12 = scmp.ne.s32.totalorder %s2466_s21, %s1908_s11 }
 0x1d5   : > { %849 = vrot.lane.b32.xlu0 %v2385_v6, %s2010_s24  ;;  %p1910_p13 = pnand %p1909_p12, %p2543_p1 }
 0x1d7   : > { %p1911_p0 = pneg %p1910_p13 }
 0x23b   : > { %v485_v10 = vpop.permute.xlu0 %484  ;;  %v602_v13 = vpop.permute.xlu1 %601 }
 0x23c   : > { %v491_v11 = vsel %vm486_vm2, %v485_v10, 0 }
 0x23d   : > { %1444 = vmatpush3.bf16.xpose.msra.mxu1 %v491_v11 }
 0x23e   : > { %1455 = vmatprep.subr.bf16.mxu1 %v2002_v0 }
 0x23f   : > { %v604_v12 = vpop.permute.xlu0 %603  ;;  %v728_v15 = vpop.permute.xlu1 %727 }
 0x240   : > { %v609_v14 = vsel %vm486_vm2, %v604_v12, 0  ;;  %v733_v16 = vsel %vm486_vm2, %v728_v15, 0 }
 0x243   : > { %v852_v17 = vpop.permute.xlu1 %851  ;;  %v726_v18 = vpop.permute.xlu0 %725 }
 0x244   : > { %1446 = vmatmul.mubr.msk.bf16.vlgmr.msra.gmra.mrb[0].mxu1 %vm486_vm2, %v2385_v6  ;;  %v857_v19 = vsel %vm486_vm2, %v852_v17, 0 }
 0x245   : > { %1456 = vmatpush3.bf16.xpose.msra.mxu1 %v609_v14  ;;  %1457 = vmatprep.mubr.msk.bf16.mxu1 %vm2003_vm0, %v2002_v0 }
 0x246   : > { %1467 = vmatprep.subr.bf16.mxu1 %v2002_v0 }
 0x247   : > { %v850_v20 = vpop.permute.xlu0 %849 }
 0x24c   : > { %1458 = vmatmul.mubr.msk.bf16.vlgmr.msra.gmra.mrb[4].mxu1 %vm486_vm2, %v602_v13 }
 0x24d   : > { %1468 = vmatpush3.bf16.xpose.msra.mxu1 %v733_v16  ;;  %1469 = vmatprep.mubr.msk.bf16.mxu1 %vm2003_vm0, %v2002_v0 }
 0x24e   : > { %1479 = vmatprep.subr.bf16.mxu1 %v2002_v0 }
 0x254   : > { %1470 = vmatmul.mubr.msk.bf16.vlgmr.msra.gmra.mrb[8].mxu1 %vm486_vm2, %v726_v18 }
 0x255   : > { %1480 = vmatpush3.bf16.xpose.msra.mxu1 %v857_v19  ;;  %1481 = vmatprep.mubr.msk.bf16.mxu1 %vm2003_vm0, %v2002_v0 }
 0x256   : > { %1491 = vmatprep.subr.bf16.mxu1 %v2002_v0 }
 0x25c   : > { %1482 = vmatmul.mubr.msk.bf16.vlgmr.msra.gmra.mrb[12].mxu1 %vm486_vm2, %v850_v20 }
 0x25d   : > { %1495 = vmatprep.mubr.msk.bf16.mxu1 %vm2003_vm0, %v2002_v0 }
 0x317   : > { %v527_v23 = vpop.f32.mrb[0].mxu1 }
 0x318   : > { %v533_v24 = vmul.f32 0.35355338, %v527_v23  ;;  %v1447_v25 = vpop.f32.mrb[1].mxu1 }
 0x319   : > { %v530_v26 = vpop.f32.mrb[2].mxu1 }
 0x31a   : > { %v1448_v27 = vpop.f32.mrb[3].mxu1  ;;  %v536_v28 = vadd.f32 %v535_v22, %v533_v24 }
 0x31c   : > { %v537_v29 = vsel %vm486_vm2, %v536_v28, -inf }
 0x31d   : > { %538 = vmax.xlane.f32.xlu1 %v537_v29 }
 0x31f   : > { %v645_v31 = vpop.f32.mrb[4].mxu1 }
 0x320   : > { %v651_v32 = vmul.f32 0.35355338, %v645_v31  ;;  %v1459_v33 = vpop.f32.mrb[5].mxu1 }
 0x321   : > { %v648_v34 = vpop.f32.mrb[6].mxu1 }
 0x322   : > { %v1460_v35 = vpop.f32.mrb[7].mxu1  ;;  %v655_v36 = vadd.f32 %v654_v30, %v651_v32 }
 0x324   : > { %v656_v38 = vsel %vm486_vm2, %v655_v36, -inf }
 0x325   : > { %657 = vmax.xlane.f32.xlu0 %v656_v38 }
 0x327   : > { %v769_v40 = vpop.f32.mrb[8].mxu1 }
 0x328   : > { %v775_v41 = vmul.f32 0.35355338, %v769_v40  ;;  %v1471_v42 = vpop.f32.mrb[9].mxu1 }
 0x329   : > { %v772_v43 = vpop.f32.mrb[10].mxu1 }
 0x32a   : > { %v1472_v44 = vpop.f32.mrb[11].mxu1  ;;  %v779_v45 = vadd.f32 %v778_v39, %v775_v41 }
 0x32c   : > { %v780_v46 = vsel %vm486_vm2, %v779_v45, -inf }
 0x32d   : > { %781 = vmax.xlane.f32.xlu0 %v780_v46 }
 0x32f   : > { %v893_v48 = vpop.f32.mrb[12].mxu1 }
 0x330   : > { %v899_v49 = vmul.f32 0.35355338, %v893_v48  ;;  %v1483_v50 = vpop.f32.mrb[13].mxu1  ;;  %v1657_v48 = vld [vmem:[#allocation8 + $0x8] sm:$0xff]  }
 0x331   : > { %v896_v51 = vpop.f32.mrb[14].mxu1 }
 0x332   : > { %v1484_v52 = vpop.f32.mrb[15].mxu1  ;;  %v903_v53 = vadd.f32 %v902_v47, %v899_v49  ;;  %v1656_v47 = vld [vmem:[#allocation8] sm:$0xff]  }
 0x333   : > { %1492 = vmatpush3.bf16.msra.mxu1 %v1656_v47 }
 0x334   : > { %v904_v54 = vsel %vm486_vm2, %v903_v53, -inf  ;;  %1493 = vmatprep.subr.bf16.mxu1 %v2002_v0 }
 0x335   : > { %905 = vmax.xlane.f32.xlu1 %v904_v54 }
 0x337   : > { %1494 = vmatpush3.bf16.msra.mxu1 %v1657_v48 }
 0x338   : > { %1507 = vmatprep.subr.bf16.mxu1 %v2002_v0 }
 0x3aa   : > { %v539_v55 = vpop.xlane.xlu1 %538 }
 0x3ab   : > { %v540_v56 = vsub.f32 %v536_v28, %v539_v55 }
 0x3ad   : > { %v541_v57 = vmul.f32 1.442695, %v540_v56 }
 0x3af   : > { %1664 = vpow2.f32 %v541_v57 }
 0x3b2   : > { %v658_v58 = vpop.xlane.xlu0 %657 }
 0x3b3   : > { %v659_v59 = vsub.f32 %v655_v36, %v658_v58 }
 0x3b5   : > { %v660_v60 = vmul.f32 1.442695, %v659_v59 }
 0x3b7   : > { %1666 = vpow2.f32 %v660_v60 }
 0x3b9   : > { %v1665_v61 = vpop.eup %1664 }
 0x3ba   : > { %v782_v62 = vpop.xlane.xlu0 %781  ;;  %v543_v63 = vsel %vm486_vm2, %v1665_v61, 0.0 }
 0x3bb   : > { %v783_v1 = vsub.f32 %v779_v45, %v782_v62  ;;  %544 = vadd.xlane.f32.xlu0 %v543_v63  ;;  %v1658_v63 = vld [vmem:[#allocation11] sm:$0xff]  }
 0x3bd   : > { %v784_v2 = vmul.f32 1.442695, %v783_v1  ;;  %v1659_v1 = vld [vmem:[#allocation11 + $0x8] sm:$0xff]  }
 0x3bf   : > { %1668 = vpow2.f32 %v784_v2 }
 0x3c1   : > { %v1667_v4 = vpop.eup %1666 }
 0x3c2   : > { %v662_v5 = vsel %vm486_vm2, %v1667_v4, 0.0  ;;  %v906_v9 = vpop.xlane.xlu1 %905 }
 0x3c3   : > { %663 = vadd.xlane.f32.xlu1 %v662_v5  ;;  %v907_v10 = vsub.f32 %v903_v53, %v906_v9 }
 0x3c5   : > { %v908_v11 = vmul.f32 1.442695, %v907_v10 }
 0x3c7   : > { %1670 = vpow2.f32 %v908_v11  ;;  %v1660_v11 = vld [vmem:[#allocation14] sm:$0xff]  }
 0x3c9   : > { %v1669_v7 = vpop.eup %1668 }
 0x3ca   : > { %v786_v8 = vsel %vm486_vm2, %v1669_v7, 0.0 }
 0x3cb   : > { %787 = vadd.xlane.f32.xlu0 %v786_v8 }
 0x3d1   : > { %v1671_v12 = vpop.eup %1670 }
 0x3d2   : > { %v910_v13 = vsel %vm486_vm2, %v1671_v12, 0.0 }
 0x3d4   : > { %668 = vrot.lane.b32.xlu1 %v2385_v6, %s2011_s13  ;;  %s2464_s13 = scalar_lea.hbm %s2517_s8, %s1399_s20 }
 0x3e1   : > { %549 = vrot.lane.b32.xlu0 %v2385_v6, %s2012_s1  ;;  %s1199_s1 = scalar_lea.sflag [#allocation5], %s2344_s22 }
 0x3e5   : > { %916 = vrot.lane.b32.xlu0 %v2385_v6, %s2013_s14  ;;  %s1912_s14 = sshll.u32 %s2018_s10, 4  ;;  %s1913_s14 = int_to_ptr.vmem [resolvable:$false] %s1912_s14 }
 0x3e6   : > { %p1915_p2 = scmp.lt.s32.totalorder %s2466_s21, %s1913_s14 }
 0x3f8   : > { %911 = vadd.xlane.f32.xlu1 %v910_v13  ;;  %v1662_v13 = vld [vmem:[#allocation14 + $0x10] sm:$0xff]  }
 0x409   : > { %792 = vrot.lane.b32.xlu1 %v2385_v6, %s2014_s16  ;;  %s1914_s16 = scalar_lea.vmem %s1913_s14, 256 }
 0x40a   : > { %p1916_p3 = scmp.lt.s32.totalorder %s1914_s16, %s1908_s11 }
 0x40c   : > { %p1917_p6 = por %p1916_p3, %p1915_p2 }
 0x40e   : > { %p1918_p10 = pnand %p1917_p6, %p1911_p0 }
 0x448   : > { %v545_v14 = vpop.xlane.xlu0 %544 }
 0x449   : > { %1672 = vrcp.f32 %v545_v14  ;;  %v1663_v14 = vld [vmem:[#allocation14 + $0x18] sm:$0xff]  }
 0x450   : > { %v664_v15 = vpop.xlane.xlu1 %663 }
 0x451   : > { %1674 = vrcp.f32 %v664_v15  ;;  %v1388_v15 = vld [vmem:[#allocation12] ss:$0 sm:$0xff] }
 0x453   : > { %v1673_v16 = vpop.eup %1672 }
 0x454   : > { %v547_v18 = vmul.f32 %v1673_v16, %v1665_v61  ;;  %v669_v21 = vpop.permute.xlu1 %668 }
 0x455   : > { %v674_v24 = vsel %vm554_vm3, %v669_v21, 0 }
 0x456   : > { %v548_v22 = vpack.c.bf16 %v547_v18, %v547_v18 }
 0x458   : > { %v788_v17 = vpop.xlane.xlu0 %787 }
 0x459   : > { %1676 = vrcp.f32 %v788_v17 }
 0x45b   : > { %v1675_v23 = vpop.eup %1674 }
 0x45c   : > { %v550_v19 = vpop.permute.xlu0 %549  ;;  %v666_v6 = vmul.f32 %v1675_v23, %v1667_v4 }
 0x45d   : > { %v556_v20 = vsel %vm554_vm3, %v550_v19, 0 }
 0x45e   : > { %1450 = vmatpush3.bf16.msra.mxu0 %v556_v20  ;;  %v667_v25 = vpack.c.bf16 %v666_v6, %v666_v6 }
 0x45f   : > { %1461 = vmatprep.subr.bf16.mxu0 %v2002_v0 }
 0x460   : > { %v917_v31 = vpop.permute.xlu0 %916 }
 0x461   : > { %1452 = vmatmul.mubr.msk.bf16.vlgmr.msra.gmra.mrb[4].mxu0 %vm486_vm2, %v548_v22  ;;  %v922_v33 = vsel %vm554_vm3, %v917_v31, 0 }
 0x462   : > { %1462 = vmatpush3.bf16.msra.mxu0 %v674_v24  ;;  %1463 = vmatprep.mubr.msk.bf16.mxu0 %vm2003_vm0, %v2002_v0 }
 0x463   : > { %1473 = vmatprep.subr.bf16.mxu0 %v2002_v0  ;;  %v1677_v26 = vpop.eup %1676 }
 0x464   : > { %v790_v28 = vmul.f32 %v1677_v26, %v1669_v7 }
 0x466   : > { %v791_v32 = vpack.c.bf16 %v790_v28, %v790_v28  ;;  %v1392_v28 = vld [vmem:[#allocation15] ss:$0 sm:$0xff] }
 0x469   : > { %1464 = vmatmul.mubr.msk.bf16.vlgmr.msra.gmra.mrb[8].mxu0 %vm486_vm2, %v667_v25 }
 0x46a   : > { %1475 = vmatprep.mubr.msk.bf16.mxu0 %vm2003_vm0, %v2002_v0 }
 0x485   : > { %v912_v27 = vpop.xlane.xlu1 %911 }
 0x486   : > { %1678 = vrcp.f32 %v912_v27 }
 0x489   : > { %v793_v29 = vpop.permute.xlu1 %792 }
 0x48a   : > { %v798_v30 = vsel %vm554_vm3, %v793_v29, 0 }
 0x48b   : > { %1474 = vmatpush3.bf16.msra.mxu0 %v798_v30 }
 0x48c   : > { %1485 = vmatprep.subr.bf16.mxu0 %v2002_v0 }
 0x48e   : > { %1476 = vmatmul.mubr.msk.bf16.vlgmr.msra.gmra.mrb[12].mxu0 %vm486_vm2, %v791_v32 }
 0x48f   : > { %1486 = vmatpush3.bf16.msra.mxu0 %v922_v33  ;;  %1487 = vmatprep.mubr.msk.bf16.mxu0 %vm2003_vm0, %v2002_v0 }
 0x490   : > { %v1679_v34 = vpop.eup %1678  ;;  %1499 = vmatprep.subr.bf16.mxu0 %v2002_v0 }
 0x491   : > { %v914_v35 = vmul.f32 %v1679_v34, %v1671_v12  ;;  %v1661_v12 = vld [vmem:[#allocation14 + $0x8] sm:$0xff]  }
 0x493   : > { %v915_v36 = vpack.c.bf16 %v914_v35, %v914_v35 }
 0x496   : > { %1488 = vmatmul.mubr.msk.bf16.vlgmr.msra.gmra.mrb[16].mxu0 %vm486_vm2, %v915_v36 }
 0x497   : > { %1503 = vmatprep.mubr.msk.bf16.mxu0 %vm2003_vm0, %v2002_v0  ;;  %1500 = vmatpush3.bf16.msra.mxu0 %v1658_v63 }
 0x498   : > { %1501 = vmatprep.subr.bf16.mxu0 %v2002_v0 }
 0x49b   : > { %1502 = vmatpush3.bf16.msra.mxu0 %v1659_v1 }
 0x534   : > { %v592_v37 = vpop.f32.mrb[4].mxu0 }
 0x535   : > { %v598_v38 = vpack.c.bf16 %v592_v37, %v592_v37  ;;  %v1453_v39 = vpop.f32.mrb[5].mxu0 }
 0x536   : > { %v595_v40 = vpop.f32.mrb[6].mxu0 }
 0x537   : > { %600 = vst.msk [vmem:[#allocation2] sm:$0xf] %vm599_vm4, %v598_v38  ;;  %v1454_v41 = vpop.f32.mrb[7].mxu0 }
 0x53c   : > { %v710_v42 = vpop.f32.mrb[8].mxu0 }
 0x53d   : > { %v1402_v43 = vpack.c.bf16 %v710_v42, %v710_v42  ;;  %v1465_v44 = vpop.f32.mrb[9].mxu0 }
 0x53e   : > { %v713_v45 = vpop.f32.mrb[10].mxu0 }
 0x53f   : > { %720 = vrot.lane.b32.xlu1 %v1402_v43, %s2015_s17  ;;  %v1466_v46 = vpop.f32.mrb[11].mxu0 }
 0x561   : > { %v834_v49 = vpop.f32.mrb[12].mxu0 }
 0x562   : > { %v1403_v50 = vpack.c.bf16 %v834_v49, %v834_v49  ;;  %v1477_v51 = vpop.f32.mrb[13].mxu0 }
 0x563   : > { %v837_v52 = vpop.f32.mrb[14].mxu0 }
 0x564   : > { %844 = vrot.lane.b32.xlu0 %v1403_v50, %s2016_s12  ;;  %v1478_v53 = vpop.f32.mrb[15].mxu0 }
 0x569   : > { %v958_v54 = vpop.f32.mrb[16].mxu0 }
 0x56a   : > { %v1404_v55 = vpack.c.bf16 %v958_v54, %v958_v54  ;;  %v1489_v56 = vpop.f32.mrb[17].mxu0 }
 0x56b   : > { %v961_v57 = vpop.f32.mrb[18].mxu0 }
 0x56c   : > { %968 = vrot.lane.b32.xlu1 %v1404_v55, %s2017_s19  ;;  %v1490_v58 = vpop.f32.mrb[19].mxu0 }
 0x5b1   : > { %v721_v59 = vpop.permute.xlu1 %720 }
 0x5b2   : > { %724 = vst.msk [vmem:[#allocation2] sm:$0xf] %vm723_vm5, %v721_v59 }
 0x5d6   : > { %v845_v60 = vpop.permute.xlu0 %844 }
 0x5d7   : > { %848 = vst.msk [vmem:[#allocation2] sm:$0xf] %vm847_vm6, %v845_v60 }
 0x5de   : > { %v969_v61 = vpop.permute.xlu1 %968 }
 0x5df   : > { %972 = vst.msk [vmem:[#allocation2] sm:$0xf] %vm971_vm7, %v969_v61 }
 0x5e6   : > { %v973_v62 = vld [vmem:[#allocation2] sm:$0xf] }
 0x5e7   : > { %1496 = vmatmul.mubr.msk.bf16.vlgmr.msra.gmra.mrb[16].mxu1 %vm438_vm1, %v973_v62 }
 0x5e8   : > { %1515 = vmatprep.mubr.msk.bf16.mxu1 %vm2003_vm0, %v2002_v0  ;;  %1508 = vmatpush3.bf16.msra.mxu1 %v1660_v11 }
 0x5e9   : > { %1509 = vmatprep.subr.bf16.mxu1 %v2002_v0 }
 0x5ec   : > { %1510 = vmatpush3.bf16.msra.mxu1 %v1661_v12 }
 0x5ed   : > { %1511 = vmatprep.subr.bf16.mxu1 %v2002_v0 }
 0x5f0   : > { %1512 = vmatpush3.bf16.msra.mxu1 %v1662_v13 }
 0x5f1   : > { %1513 = vmatprep.subr.bf16.mxu1 %v2002_v0 }
 0x5f4   : > { %1514 = vmatpush3.bf16.msra.mxu1 %v1663_v14 }
 0x6ba   : > { %v1027_v2 = vpop.f32.mrb[16].mxu1 }
 0x6bb   : > { %v1033_v4 = vsub.f32 1.0, %v1027_v2  ;;  %v1497_v5 = vpop.f32.mrb[17].mxu1 }
 0x6bc   : > { %v1030_v7 = vpop.f32.mrb[18].mxu1 }
 0x6bd   : > { %v1034_v8 = vmul.f32 %v1033_v4, %v2376_v3  ;;  %v1498_v9 = vpop.f32.mrb[19].mxu1 }
 0x6bf   : > { %v1035_v10 = vpack.c.bf16 %v1034_v8, %v1034_v8 }
 0x6c1   : > { %1504 = vmatmul.mubr.msk.bf16.vlgmr.msra.gmra.mrb[20].mxu0 %vm438_vm1, %v1035_v10 }
 0x794   : > { %v1096_v3 = vpop.f32.mrb[20].mxu0 }
 0x795   : > { %v1097_v16 = vadd.f32 %v1388_v15, %v1096_v3  ;;  %v1505_v17 = vpop.f32.mrb[21].mxu0 }
 0x796   : > { %v1099_v18 = vpop.f32.mrb[22].mxu0 }
 0x797   : > { %v1102_v19 = vmul.f32 %v1097_v16, %v1097_v16  ;;  %v1506_v20 = vpop.f32.mrb[23].mxu0 }
 0x799   : > { %v1103_v21 = vmul.f32 %v1102_v19, %v1097_v16 }
 0x79b   : > { %v1104_v22 = vmul.f32 0.044715, %v1103_v21 }
 0x79d   : > { %v1105_v23 = vadd.f32 %v1104_v22, %v1097_v16 }
 0x79f   : > { %v1106_v24 = vmul.f32 0.7978846, %v1105_v23 }
 0x7a1   : > { %1680 = vtanh.f32 %v1106_v24 }
 0x7ab   : > { %v1681_v6 = vpop.eup %1680 }
 0x7ac   : > { %v1108_v25 = vadd.f32 1.0, %v1681_v6 }
 0x7ae   : > { %v1109_v26 = vmul.f32 0.5, %v1108_v25 }
 0x7b0   : > { %v1110_v0 = vmul.f32 %v1109_v26, %v1097_v16 }
 0x7b2   : > { %v1111_v27 = vpack.c.bf16 %v1110_v0, %v1110_v0 }
 0x7b4   : > { %1516 = vmatmul.mubr.msk.bf16.vlgmr.msra.gmra.mrb[20].mxu1 %vm1151_vm8, %v1111_v27 }
 0x887   : > { %v1189_v29 = vpop.f32.mrb[20].mxu1 }
 0x888   : > { %v1190_v30 = vadd.f32 %v1392_v28, %v1189_v29  ;;  %v1517_v31 = vpop.f32.mrb[21].mxu1 }
 0x889   : > { %v1192_v32 = vpop.f32.mrb[22].mxu1 }
 0x88a   : > { %v1195_v33 = vsub.f32 1.0, %v1190_v30  ;;  %v1518_v34 = vpop.f32.mrb[23].mxu1 }
 0x88c   : > { %v1196_v35 = vmul.f32 %v1195_v33, %v1034_v8 }
 0x88e   : > { %1197 = vst.msk [vmem:[%s418_s18] sm:$0xff] %vm438_vm1, %v1196_v35 }
 0x88f   : > { %1921 = shalt.err (!%p1918_p10)
}
 0x890   : > { %s1922_s22 = scalar_lea.hbm %s2464_s13, 128  ;;  %s1926_s19 = scalar_lea.hbm %s2517_s8, 256 }
 0x891   : > { %p1923_p11 = scmp.ne.s32.totalorder %s2464_s13, %s1922_s22  ;;  %p1927_p9 = scmp.lt.u32.totalorder %s2464_s13, %s2517_s8 }
 0x892   : > { %p1928_p7 = scmp.lt.u32.totalorder %s1926_s19, %s1922_s22  ;;  %p1930_p12 = scmp.lt.u32.totalorder %s1922_s22, %s2464_s13 }
 0x893   : > { %p1924_p8 = pnand %p1923_p11, %p2543_p1 }
 0x894   : > { %p1929_p4 = por %p1928_p7, %p1927_p9 }
 0x895   : > { %p1925_p5 = pneg %p1924_p8 }
 0x896   : > { %p1931_p13 = por %p1930_p12, %p1929_p4 }
 0x898   : > { %p1932_p0 = pnand %p1931_p13, %p1925_p5 }
 0x89a   : > { %1935 = shalt.err (!%p1932_p0)
}
 0x89b   : > { %1549 = dma.vmem_to_hbm [thread:$0]  (%p2543_p1), %s2466_s21, 128, %s2464_s13, %s1199_s1  }
 0x89c PF: > { %s1224_s23 = sand.u32 1, %s1978_s27   ;;  %p2544_p2 = scmp.ne.s32.totalorder %s2532_s26, 0 }
 0x89d   : > { %p2545_p3 = scmp.ge.s32.totalorder %s1990_s30, 2  ;;  %s1225_s24 = scalar_lea.sflag [#allocation5], %s1224_s23 }
 0x89f   : > { %p1578_p6 = pnand %p2545_p3, %p2544_p2 }
 0x8a1   : > { %1973 = dma.done.wait (!%p1578_p6), %s1225_s24, 128  }
 0x8a2   : > { %1975 = vsyncadd (!%p1578_p6), %s1225_s24, 4294967168  ;;  %p25_p10 = scmp.ge.s32.totalorder %s2274_s15, 4   ;;  %s2546_s27 = smov %s1982_s28 }
 0x8a3   : > { %s2547_s28 = smov %s1986_s29  ;;  %s2548_s29 = smov %s2286_s9 }
 0x8a4   : > { %s2549_s30 = smov %s2274_s15  ;;  %27 = sbr.rel (!%p25_p10) target bundleno = 11 (0xb), region = 128 }
 0x8ab   :  { %1230 = vsyncpa [#allocation4], 1 }
 0x8ac   :  { %1232 = vsyncpa [#allocation4 + $0x1], 1 }
 0x8ad   :  { %1233 = vsyncpa [#allocation7], 1 }
 0x8ae   :  { %1234 = vsyncpa [#allocation10], 1 }
 0x8af   :  { %1235 = vsyncpa [#allocation13], 1 }
 0x8b0   :  { %1236 = vsyncpa [#allocation16], 1 }
 0x8b1   :  { %1237 = vsyncpa [#allocation5], 1 }
 0x8b2   :  { %1239 = vsyncpa [#allocation5 + $0x1], 1 }

</bundles_post_ra>
